<compile_context>
chip_gen: v5e
topology: v5e:2x2
jax: 0.10.0
libtpu: 0.0.40
codegen_flags: <defaults>
</compile_context>

<pallas_src>
import functools

import jax
import jax.numpy as jnp
from jax import lax
from jax.experimental import pallas as pl
from jax.experimental.pallas import tpu as pltpu

INPUT_DIM = 64        # conv1 in-channels
HIDDEN_DIM = 128      # conv out-channels (also the lane width everywhere)
LATENT_DIM = 32
SEQ_LEN = 64          # 64 -> 32 -> 16, so fc_in = HIDDEN_DIM * 16 (as in the module)
NPOS = 16             # rows/sample everywhere: input pos-groups of 4, conv1-even,
                      # conv1-odd and conv2 all have 16 positions
OUT_PAD = 128         # [mu(32) | logvar(32) | zero pad] -> lane-dense output


def encoder_kernel(x_ref, w1cr_ref, w10l_ref, b1_ref, w2_ref, b2_ref,
                   wfc_ref, bfc_ref, out_ref):
    tb = out_ref.shape[0]
    n = NPOS * tb
    f32 = jnp.float32
    bf16 = jnp.bfloat16
    H = HIDDEN_DIM

    # x_ref: (16, tb, 256) bf16, row m holds raw input positions 4m..4m+3
    # (64 channels each) along lanes.  Only leading-dim / 128-aligned slices.
    x4 = x_ref[...]
    xA = x4[:, :, :H].reshape(n, H)     # lanes: [x[4m]   | x[4m+1]]
    xB = x4[:, :, H:].reshape(n, H)     # lanes: [x[4m+2] | x[4m+3]]

    w1cr = w1cr_ref[...]                # rows: [center tap ; right tap]
    w10l = w10l_ref[...]                # rows: [zeros      ; left tap]
    b1 = b1_ref[...]

    # ---- conv1 (k=3, stride=2, pad=1), outputs split by parity -------------
    # even output 2m   uses x[4m-1](L), x[4m](C),   x[4m+1](R)
    # odd  output 2m+1 uses x[4m+1](L), x[4m+2](C), x[4m+3](R)
    pe = jnp.dot(xA, w1cr, preferred_element_type=f32)                # C+R of even
    po = (jnp.dot(xA, w10l, preferred_element_type=f32) +
          jnp.dot(xB, w10l * 0 + w1cr, preferred_element_type=f32)
          if False else
          jnp.dot(xA, w10l, preferred_element_type=f32) +
          jnp.dot(xB, w1cr, preferred_element_type=f32))              # odd, all taps
    # left tap of the even outputs: x[4m-1] lives in the PREVIOUS row of xB;
    # row 0 is conv1's zero padding -> shift the f32 matmul result down by one
    # position (zeros || v[:-1]); shifting the result == shifting the input.
    pe_l = jnp.dot(xB, w10l, preferred_element_type=f32).reshape(NPOS, tb, H)
    pe_l = jnp.concatenate(
        [jnp.zeros((1, tb, H), f32), pe_l[:NPOS - 1]], axis=0).reshape(n, H)
    h1_even = jnp.maximum(pe + pe_l + b1, 0.0).astype(bf16)          # conv1 @ 2m
    h1_odd = jnp.maximum(po + b1, 0.0).astype(bf16)                  # conv1 @ 2m+1

    # ---- conv2 (k=3, stride=2, pad=1): K-accumulated over the 3 taps --------
    # output m uses h1[2m-1]=h1_odd[m-1] (L), h1[2m]=h1_even[m] (C),
    #               h1[2m+1]=h1_odd[m] (R); h1[-1] is zero padding.
    w2l, w2c, w2r = w2_ref[0], w2_ref[1], w2_ref[2]
    q = (jnp.dot(h1_even, w2c, preferred_element_type=f32) +
         jnp.dot(h1_odd, w2r, preferred_element_type=f32))
    ql = jnp.dot(h1_odd, w2l, preferred_element_type=f32).reshape(NPOS, tb, H)
    ql = jnp.concatenate(
        [jnp.zeros((1, tb, H), f32), ql[:NPOS - 1]], axis=0).reshape(n, H)
    h2 = jnp.maximum(q + ql + b2_ref[...], 0.0).astype(bf16).reshape(NPOS, tb, H)

    # ---- fc_mu / fc_logvar fused along N (padded to 128 lanes) --------------
    # K-accumulate over the 16 positions instead of a 2048-lane concatenation.
    acc = jnp.zeros((tb, OUT_PAD), f32)
    for m in range(NPOS):
        acc = acc + jnp.dot(h2[m], wfc_ref[m], preferred_element_type=f32)
    out_ref[...] = acc + bfc_ref[...]


def _round_up(v, m):
    return ((v + m - 1) // m) * m


def _prep_input(x, b_pad):
    """x: (B, INPUT_DIM, SEQ_LEN) f32 (PyTorch NCL) ->
    (16, b_pad, 256) bf16: row m = raw positions 4m..4m+3 along lanes."""
    b = x.shape[0]
    xp = jnp.transpose(x, (0, 2, 1))                      # (B, 64 pos, 64 ch)
    x4 = xp.reshape(b, NPOS, 4 * INPUT_DIM)               # (B, 16, 256)
    x4 = jnp.transpose(x4, (1, 0, 2))                     # (16, B, 256)
    if b_pad != b:
        x4 = jnp.pad(x4, ((0, 0), (0, b_pad - b), (0, 0)))
    return x4.astype(jnp.bfloat16)


def _prep_params(p):
    w1 = p["w1"]                                           # (128, 64, 3)
    w1_l = jnp.transpose(w1[:, :, 0])                      # (64, 128) per-tap, (c, h)
    w1_c = jnp.transpose(w1[:, :, 1])
    w1_r = jnp.transpose(w1[:, :, 2])
    w1cr = jnp.concatenate([w1_c, w1_r], axis=0)           # (128, 128)
    w10l = jnp.concatenate([jnp.zeros_like(w1_l), w1_l], axis=0)

    w2 = p["w2"]                                           # (128, 128, 3)
    w2_stack = jnp.stack([jnp.transpose(w2[:, :, 0]),      # left
                          jnp.transpose(w2[:, :, 1]),      # center
                          jnp.transpose(w2[:, :, 2])],     # right
                         axis=0)                           # (3, 128, 128)

    # PyTorch flattens (B, 128 ch, 16 pos) as feature = c*16 + m.
    wmu = p["w_mu"].reshape(LATENT_DIM, HIDDEN_DIM, NPOS)      # (32, 128, 16)
    wlv = p["w_logvar"].reshape(LATENT_DIM, HIDDEN_DIM, NPOS)
    whead = jnp.concatenate([wmu, wlv], axis=0)                # (64, 128, 16)
    whead = jnp.pad(whead, ((0, OUT_PAD - 2 * LATENT_DIM), (0, 0), (0, 0)))
    wfc = jnp.transpose(whead, (2, 1, 0))                      # (16, 128, 128) [m,c,o]

    b1 = p["b1"].reshape(1, HIDDEN_DIM).astype(jnp.float32)
    b2 = p["b2"].reshape(1, HIDDEN_DIM).astype(jnp.float32)
    bfc = jnp.pad(jnp.concatenate([p["b_mu"], p["b_logvar"]]),
                  (0, OUT_PAD - 2 * LATENT_DIM)).reshape(1, OUT_PAD).astype(jnp.float32)
    return (w1cr.astype(jnp.bfloat16), w10l.astype(jnp.bfloat16), b1,
            w2_stack.astype(jnp.bfloat16), b2,
            wfc.astype(jnp.bfloat16), bfc)


@functools.partial(jax.jit, static_argnames=("tb",))
def encoder_forward(x, params, tb=128):
    """x: (B, INPUT_DIM, SEQ_LEN) float32 (PyTorch NCL). Returns (mu, logvar)."""
    b = x.shape[0]
    assert x.shape[1] == INPUT_DIM and x.shape[2] == SEQ_LEN

    b8 = _round_up(b, 8)
    tb_eff = min(_round_up(tb, 8), b8)
    # Keep >= 2 "parallel" grid steps when the batch allows it (v7x has 2 TCs).
    if b8 // tb_eff < 2 and b8 >= 16:
        tb_eff = _round_up(b8 // 2, 8)
    b_pad = _round_up(b, tb_eff)

    x4 = _prep_input(x, b_pad)
    w1cr, w10l, b1, w2s, b2, wfc, bfc = _prep_params(params)

    out = pl.pallas_call(
        encoder_kernel,
        out_shape=jax.ShapeDtypeStruct((b_pad, OUT_PAD), jnp.float32),
        grid=(b_pad // tb_eff,),
        in_specs=[
            pl.BlockSpec((NPOS, tb_eff, 4 * INPUT_DIM), lambda i: (0, i, 0)),
            pl.BlockSpec((HIDDEN_DIM, HIDDEN_DIM), lambda i: (0, 0)),
            pl.BlockSpec((HIDDEN_DIM, HIDDEN_DIM), lambda i: (0, 0)),
            pl.BlockSpec((1, HIDDEN_DIM), lambda i: (0, 0)),
            pl.BlockSpec((3, HIDDEN_DIM, HIDDEN_DIM), lambda i: (0, 0, 0)),
            pl.BlockSpec((1, HIDDEN_DIM), lambda i: (0, 0)),
            pl.BlockSpec((NPOS, HIDDEN_DIM, OUT_PAD), lambda i: (0, 0, 0)),
            pl.BlockSpec((1, OUT_PAD), lambda i: (0, 0)),
        ],
        out_specs=pl.BlockSpec((tb_eff, OUT_PAD), lambda i: (i, 0)),
        compiler_params=pltpu.CompilerParams(
            dimension_semantics=("parallel",),
            vmem_limit_bytes=32 * 1024 * 1024,
        ),
    )(x4, w1cr, w10l, b1, w2s, b2, wfc, bfc)

    out = out[:b]
    return out[:, :LATENT_DIM], out[:, LATENT_DIM:2 * LATENT_DIM]


def reference_forward(x, p):
    # Pure-JAX f32 reference mirroring the PyTorch module.
    y = lax.conv_general_dilated(x, p["w1"], window_strides=(2,), padding=((1, 1),),
                                 dimension_numbers=("NCH", "OIH", "NCH"))
    y = jax.nn.relu(y + p["b1"][None, :, None])
    y = lax.conv_general_dilated(y, p["w2"], window_strides=(2,), padding=((1, 1),),
                                 dimension_numbers=("NCH", "OIH", "NCH"))
    y = jax.nn.relu(y + p["b2"][None, :, None])
    flat = y.reshape(y.shape[0], -1)
    mu = flat @ p["w_mu"].T + p["b_mu"]
    lv = flat @ p["w_logvar"].T + p["b_logvar"]
    return mu, lv


if __name__ == "__main__":
    key = jax.random.PRNGKey(0)
    ks = jax.random.split(key, 9)

    def uinit(k, shape, fan_in):
        bound = 1.0 / (fan_in ** 0.5)
        return jax.random.uniform(k, shape, jnp.float32, -bound, bound)

    params = {
        "w1": uinit(ks[0], (HIDDEN_DIM, INPUT_DIM, 3), INPUT_DIM * 3),
        "b1": uinit(ks[1], (HIDDEN_DIM,), INPUT_DIM * 3),
        "w2": uinit(ks[2], (HIDDEN_DIM, HIDDEN_DIM, 3), HIDDEN_DIM * 3),
        "b2": uinit(ks[3], (HIDDEN_DIM,), HIDDEN_DIM * 3),
        "w_mu": uinit(ks[4], (LATENT_DIM, HIDDEN_DIM * NPOS), HIDDEN_DIM * NPOS),
        "b_mu": uinit(ks[5], (LATENT_DIM,), HIDDEN_DIM * NPOS),
        "w_logvar": uinit(ks[6], (LATENT_DIM, HIDDEN_DIM * NPOS), HIDDEN_DIM * NPOS),
        "b_logvar": uinit(ks[7], (LATENT_DIM,), HIDDEN_DIM * NPOS),
    }

    B = 32  # small test batch; wrapper picks tb=16 -> grid of 2 "parallel" steps
    x = jax.random.normal(ks[8], (B, INPUT_DIM, SEQ_LEN), jnp.float32)

    mu, logvar = encoder_forward(x, params)
    jax.block_until_ready((mu, logvar))

    mu_ref, lv_ref = reference_forward(x, params)
    assert mu.shape == (B, LATENT_DIM) and logvar.shape == (B, LATENT_DIM)
    # bf16 matmul inputs with f32 accumulation -> loosened tolerance.
    assert jnp.allclose(mu, mu_ref, atol=3e-2, rtol=3e-2)
    assert jnp.allclose(logvar, lv_ref, atol=3e-2, rtol=3e-2)

    print("KERNEL_OK")
</pallas_src>

<mosaic_0001>
module attributes {stable_mosaic.version = 11 : i64} {
  func.func @encoder_kernel(%arg0: i32, %arg1: memref<16x16x256xbf16, #tpu.memory_space<vmem>>, %arg2: memref<128x128xbf16, #tpu.memory_space<vmem>>, %arg3: memref<128x128xbf16, #tpu.memory_space<vmem>>, %arg4: memref<1x128xf32, #tpu.memory_space<vmem>>, %arg5: memref<3x128x128xbf16, #tpu.memory_space<vmem>>, %arg6: memref<1x128xf32, #tpu.memory_space<vmem>>, %arg7: memref<16x128x128xbf16, #tpu.memory_space<vmem>>, %arg8: memref<1x128xf32, #tpu.memory_space<vmem>>, %arg9: memref<16x128xf32, #tpu.memory_space<vmem>>) attributes {dimension_semantics = [#tpu.dimension_semantics<parallel>], iteration_bounds = array<i64: 2>, scalar_prefetch = 0 : i64, scratch_operands = 0 : i64, tpu.core_type = #tpu.core_type<tc>, window_params = [{transform_indices = @transform_0, window_bounds = array<i64: 16, 16, 256>}, {pipeline_mode = #tpu.pipeline_mode<synchronous>, transform_indices = @transform_1, window_bounds = array<i64: 128, 128>}, {pipeline_mode = #tpu.pipeline_mode<synchronous>, transform_indices = @transform_2, window_bounds = array<i64: 128, 128>}, {pipeline_mode = #tpu.pipeline_mode<synchronous>, transform_indices = @transform_3, window_bounds = array<i64: 1, 128>}, {pipeline_mode = #tpu.pipeline_mode<synchronous>, transform_indices = @transform_4, window_bounds = array<i64: 3, 128, 128>}, {pipeline_mode = #tpu.pipeline_mode<synchronous>, transform_indices = @transform_5, window_bounds = array<i64: 1, 128>}, {pipeline_mode = #tpu.pipeline_mode<synchronous>, transform_indices = @transform_6, window_bounds = array<i64: 16, 128, 128>}, {pipeline_mode = #tpu.pipeline_mode<synchronous>, transform_indices = @transform_7, window_bounds = array<i64: 1, 128>}, {transform_indices = @transform_8, window_bounds = array<i64: 16, 128>}]} {
    %c0 = arith.constant 0 : index
    %c0_0 = arith.constant 0 : index
    %c0_1 = arith.constant 0 : index
    %0 = vector.load %arg1[%c0, %c0_0, %c0_1] : memref<16x16x256xbf16, #tpu.memory_space<vmem>>, vector<16x16x256xbf16>
    %1 = vector.extract_strided_slice %0 {offsets = [0, 0, 0], sizes = [16, 16, 128], strides = [1, 1, 1]} : vector<16x16x256xbf16> to vector<16x16x128xbf16>
    %2 = vector.shape_cast %1 : vector<16x16x128xbf16> to vector<256x128xbf16>
    %3 = vector.extract_strided_slice %0 {offsets = [0, 0, 128], sizes = [16, 16, 128], strides = [1, 1, 1]} : vector<16x16x256xbf16> to vector<16x16x128xbf16>
    %4 = vector.shape_cast %3 : vector<16x16x128xbf16> to vector<256x128xbf16>
    %c0_2 = arith.constant 0 : index
    %c0_3 = arith.constant 0 : index
    %5 = vector.load %arg2[%c0_2, %c0_3] : memref<128x128xbf16, #tpu.memory_space<vmem>>, vector<128x128xbf16>
    %c0_4 = arith.constant 0 : index
    %c0_5 = arith.constant 0 : index
    %6 = vector.load %arg3[%c0_4, %c0_5] : memref<128x128xbf16, #tpu.memory_space<vmem>>, vector<128x128xbf16>
    %c0_6 = arith.constant 0 : index
    %c0_7 = arith.constant 0 : index
    %7 = vector.load %arg4[%c0_6, %c0_7] : memref<1x128xf32, #tpu.memory_space<vmem>>, vector<1x128xf32>
    %cst = arith.constant dense<0.000000e+00> : vector<256x128xf32>
    %8 = tpu.matmul %2, %5, %cst {dimension_numbers = #tpu.dot_dimension_numbers<[1], [0], [0], [1], [0, 0, 1, 1], [], []>} : vector<256x128xbf16>, vector<128x128xbf16>, vector<256x128xf32> -> vector<256x128xf32>
    %cst_8 = arith.constant dense<0.000000e+00> : vector<256x128xf32>
    %9 = tpu.matmul %2, %6, %cst_8 {dimension_numbers = #tpu.dot_dimension_numbers<[1], [0], [0], [1], [0, 0, 1, 1], [], []>} : vector<256x128xbf16>, vector<128x128xbf16>, vector<256x128xf32> -> vector<256x128xf32>
    %cst_9 = arith.constant dense<0.000000e+00> : vector<256x128xf32>
    %10 = tpu.matmul %4, %5, %cst_9 {dimension_numbers = #tpu.dot_dimension_numbers<[1], [0], [0], [1], [0, 0, 1, 1], [], []>} : vector<256x128xbf16>, vector<128x128xbf16>, vector<256x128xf32> -> vector<256x128xf32>
    %11 = arith.addf %9, %10 : vector<256x128xf32>
    %cst_10 = arith.constant dense<0.000000e+00> : vector<256x128xf32>
    %12 = tpu.matmul %4, %6, %cst_10 {dimension_numbers = #tpu.dot_dimension_numbers<[1], [0], [0], [1], [0, 0, 1, 1], [], []>} : vector<256x128xbf16>, vector<128x128xbf16>, vector<256x128xf32> -> vector<256x128xf32>
    %13 = vector.shape_cast %12 : vector<256x128xf32> to vector<16x16x128xf32>
    %cst_11 = arith.constant 0.000000e+00 : f32
    %14 = vector.broadcast %cst_11 : f32 to vector<1x16x128xf32>
    %15 = vector.extract_strided_slice %13 {offsets = [0, 0, 0], sizes = [15, 16, 128], strides = [1, 1, 1]} : vector<16x16x128xf32> to vector<15x16x128xf32>
    %16 = tpu.concatenate %14, %15 in 0 : vector<1x16x128xf32>, vector<15x16x128xf32> -> vector<16x16x128xf32>
    %17 = vector.shape_cast %16 : vector<16x16x128xf32> to vector<256x128xf32>
    %18 = arith.addf %8, %17 : vector<256x128xf32>
    %19 = vector.broadcast %7 : vector<1x128xf32> to vector<256x128xf32>
    %20 = arith.addf %18, %19 : vector<256x128xf32>
    %cst_12 = arith.constant 0.000000e+00 : f32
    %21 = vector.broadcast %cst_12 : f32 to vector<256x128xf32>
    %22 = arith.maximumf %20, %21 : vector<256x128xf32>
    %23 = arith.truncf %22 : vector<256x128xf32> to vector<256x128xbf16>
    %24 = vector.broadcast %7 : vector<1x128xf32> to vector<256x128xf32>
    %25 = arith.addf %11, %24 : vector<256x128xf32>
    %cst_13 = arith.constant 0.000000e+00 : f32
    %26 = vector.broadcast %cst_13 : f32 to vector<256x128xf32>
    %27 = arith.maximumf %25, %26 : vector<256x128xf32>
    %28 = arith.truncf %27 : vector<256x128xf32> to vector<256x128xbf16>
    %c0_14 = arith.constant 0 : index
    %c0_15 = arith.constant 0 : index
    %c0_16 = arith.constant 0 : index
    %29 = vector.load %arg5[%c0_14, %c0_15, %c0_16] : memref<3x128x128xbf16, #tpu.memory_space<vmem>>, vector<1x128x128xbf16>
    %30 = vector.shape_cast %29 : vector<1x128x128xbf16> to vector<128x128xbf16>
    %c1 = arith.constant 1 : index
    %c0_17 = arith.constant 0 : index
    %c0_18 = arith.constant 0 : index
    %31 = vector.load %arg5[%c1, %c0_17, %c0_18] : memref<3x128x128xbf16, #tpu.memory_space<vmem>>, vector<1x128x128xbf16>
    %32 = vector.shape_cast %31 : vector<1x128x128xbf16> to vector<128x128xbf16>
    %c2 = arith.constant 2 : index
    %c0_19 = arith.constant 0 : index
    %c0_20 = arith.constant 0 : index
    %33 = vector.load %arg5[%c2, %c0_19, %c0_20] : memref<3x128x128xbf16, #tpu.memory_space<vmem>>, vector<1x128x128xbf16>
    %34 = vector.shape_cast %33 : vector<1x128x128xbf16> to vector<128x128xbf16>
    %cst_21 = arith.constant dense<0.000000e+00> : vector<256x128xf32>
    %35 = tpu.matmul %23, %32, %cst_21 {dimension_numbers = #tpu.dot_dimension_numbers<[1], [0], [0], [1], [0, 0, 1, 1], [], []>} : vector<256x128xbf16>, vector<128x128xbf16>, vector<256x128xf32> -> vector<256x128xf32>
    %cst_22 = arith.constant dense<0.000000e+00> : vector<256x128xf32>
    %36 = tpu.matmul %28, %34, %cst_22 {dimension_numbers = #tpu.dot_dimension_numbers<[1], [0], [0], [1], [0, 0, 1, 1], [], []>} : vector<256x128xbf16>, vector<128x128xbf16>, vector<256x128xf32> -> vector<256x128xf32>
    %37 = arith.addf %35, %36 : vector<256x128xf32>
    %cst_23 = arith.constant dense<0.000000e+00> : vector<256x128xf32>
    %38 = tpu.matmul %28, %30, %cst_23 {dimension_numbers = #tpu.dot_dimension_numbers<[1], [0], [0], [1], [0, 0, 1, 1], [], []>} : vector<256x128xbf16>, vector<128x128xbf16>, vector<256x128xf32> -> vector<256x128xf32>
    %39 = vector.shape_cast %38 : vector<256x128xf32> to vector<16x16x128xf32>
    %cst_24 = arith.constant 0.000000e+00 : f32
    %40 = vector.broadcast %cst_24 : f32 to vector<1x16x128xf32>
    %41 = vector.extract_strided_slice %39 {offsets = [0, 0, 0], sizes = [15, 16, 128], strides = [1, 1, 1]} : vector<16x16x128xf32> to vector<15x16x128xf32>
    %42 = tpu.concatenate %40, %41 in 0 : vector<1x16x128xf32>, vector<15x16x128xf32> -> vector<16x16x128xf32>
    %43 = vector.shape_cast %42 : vector<16x16x128xf32> to vector<256x128xf32>
    %44 = arith.addf %37, %43 : vector<256x128xf32>
    %c0_25 = arith.constant 0 : index
    %c0_26 = arith.constant 0 : index
    %45 = vector.load %arg6[%c0_25, %c0_26] : memref<1x128xf32, #tpu.memory_space<vmem>>, vector<1x128xf32>
    %46 = vector.broadcast %45 : vector<1x128xf32> to vector<256x128xf32>
    %47 = arith.addf %44, %46 : vector<256x128xf32>
    %cst_27 = arith.constant 0.000000e+00 : f32
    %48 = vector.broadcast %cst_27 : f32 to vector<256x128xf32>
    %49 = arith.maximumf %47, %48 : vector<256x128xf32>
    %50 = arith.truncf %49 : vector<256x128xf32> to vector<256x128xbf16>
    %51 = vector.shape_cast %50 : vector<256x128xbf16> to vector<16x16x128xbf16>
    %cst_28 = arith.constant 0.000000e+00 : f32
    %52 = vector.broadcast %cst_28 : f32 to vector<16x128xf32>
    %53 = vector.extract_strided_slice %51 {offsets = [0, 0, 0], sizes = [1, 16, 128], strides = [1, 1, 1]} : vector<16x16x128xbf16> to vector<1x16x128xbf16>
    %54 = vector.shape_cast %53 : vector<1x16x128xbf16> to vector<16x128xbf16>
    %c0_29 = arith.constant 0 : index
    %c0_30 = arith.constant 0 : index
    %c0_31 = arith.constant 0 : index
    %55 = vector.load %arg7[%c0_29, %c0_30, %c0_31] : memref<16x128x128xbf16, #tpu.memory_space<vmem>>, vector<1x128x128xbf16>
    %56 = vector.shape_cast %55 : vector<1x128x128xbf16> to vector<128x128xbf16>
    %cst_32 = arith.constant dense<0.000000e+00> : vector<16x128xf32>
    %57 = tpu.matmul %54, %56, %cst_32 {dimension_numbers = #tpu.dot_dimension_numbers<[1], [0], [0], [1], [0, 0, 1, 1], [], []>} : vector<16x128xbf16>, vector<128x128xbf16>, vector<16x128xf32> -> vector<16x128xf32>
    %58 = arith.addf %52, %57 : vector<16x128xf32>
    %59 = vector.extract_strided_slice %51 {offsets = [1, 0, 0], sizes = [1, 16, 128], strides = [1, 1, 1]} : vector<16x16x128xbf16> to vector<1x16x128xbf16>
    %60 = vector.shape_cast %59 : vector<1x16x128xbf16> to vector<16x128xbf16>
    %c1_33 = arith.constant 1 : index
    %c0_34 = arith.constant 0 : index
    %c0_35 = arith.constant 0 : index
    %61 = vector.load %arg7[%c1_33, %c0_34, %c0_35] : memref<16x128x128xbf16, #tpu.memory_space<vmem>>, vector<1x128x128xbf16>
    %62 = vector.shape_cast %61 : vector<1x128x128xbf16> to vector<128x128xbf16>
    %cst_36 = arith.constant dense<0.000000e+00> : vector<16x128xf32>
    %63 = tpu.matmul %60, %62, %cst_36 {dimension_numbers = #tpu.dot_dimension_numbers<[1], [0], [0], [1], [0, 0, 1, 1], [], []>} : vector<16x128xbf16>, vector<128x128xbf16>, vector<16x128xf32> -> vector<16x128xf32>
    %64 = arith.addf %58, %63 : vector<16x128xf32>
    %65 = vector.extract_strided_slice %51 {offsets = [2, 0, 0], sizes = [1, 16, 128], strides = [1, 1, 1]} : vector<16x16x128xbf16> to vector<1x16x128xbf16>
    %66 = vector.shape_cast %65 : vector<1x16x128xbf16> to vector<16x128xbf16>
    %c2_37 = arith.constant 2 : index
    %c0_38 = arith.constant 0 : index
    %c0_39 = arith.constant 0 : index
    %67 = vector.load %arg7[%c2_37, %c0_38, %c0_39] : memref<16x128x128xbf16, #tpu.memory_space<vmem>>, vector<1x128x128xbf16>
    %68 = vector.shape_cast %67 : vector<1x128x128xbf16> to vector<128x128xbf16>
    %cst_40 = arith.constant dense<0.000000e+00> : vector<16x128xf32>
    %69 = tpu.matmul %66, %68, %cst_40 {dimension_numbers = #tpu.dot_dimension_numbers<[1], [0], [0], [1], [0, 0, 1, 1], [], []>} : vector<16x128xbf16>, vector<128x128xbf16>, vector<16x128xf32> -> vector<16x128xf32>
    %70 = arith.addf %64, %69 : vector<16x128xf32>
    %71 = vector.extract_strided_slice %51 {offsets = [3, 0, 0], sizes = [1, 16, 128], strides = [1, 1, 1]} : vector<16x16x128xbf16> to vector<1x16x128xbf16>
    %72 = vector.shape_cast %71 : vector<1x16x128xbf16> to vector<16x128xbf16>
    %c3 = arith.constant 3 : index
    %c0_41 = arith.constant 0 : index
    %c0_42 = arith.constant 0 : index
    %73 = vector.load %arg7[%c3, %c0_41, %c0_42] : memref<16x128x128xbf16, #tpu.memory_space<vmem>>, vector<1x128x128xbf16>
    %74 = vector.shape_cast %73 : vector<1x128x128xbf16> to vector<128x128xbf16>
    %cst_43 = arith.constant dense<0.000000e+00> : vector<16x128xf32>
    %75 = tpu.matmul %72, %74, %cst_43 {dimension_numbers = #tpu.dot_dimension_numbers<[1], [0], [0], [1], [0, 0, 1, 1], [], []>} : vector<16x128xbf16>, vector<128x128xbf16>, vector<16x128xf32> -> vector<16x128xf32>
    %76 = arith.addf %70, %75 : vector<16x128xf32>
    %77 = vector.extract_strided_slice %51 {offsets = [4, 0, 0], sizes = [1, 16, 128], strides = [1, 1, 1]} : vector<16x16x128xbf16> to vector<1x16x128xbf16>
    %78 = vector.shape_cast %77 : vector<1x16x128xbf16> to vector<16x128xbf16>
    %c4 = arith.constant 4 : index
    %c0_44 = arith.constant 0 : index
    %c0_45 = arith.constant 0 : index
    %79 = vector.load %arg7[%c4, %c0_44, %c0_45] : memref<16x128x128xbf16, #tpu.memory_space<vmem>>, vector<1x128x128xbf16>
    %80 = vector.shape_cast %79 : vector<1x128x128xbf16> to vector<128x128xbf16>
    %cst_46 = arith.constant dense<0.000000e+00> : vector<16x128xf32>
    %81 = tpu.matmul %78, %80, %cst_46 {dimension_numbers = #tpu.dot_dimension_numbers<[1], [0], [0], [1], [0, 0, 1, 1], [], []>} : vector<16x128xbf16>, vector<128x128xbf16>, vector<16x128xf32> -> vector<16x128xf32>
    %82 = arith.addf %76, %81 : vector<16x128xf32>
    %83 = vector.extract_strided_slice %51 {offsets = [5, 0, 0], sizes = [1, 16, 128], strides = [1, 1, 1]} : vector<16x16x128xbf16> to vector<1x16x128xbf16>
    %84 = vector.shape_cast %83 : vector<1x16x128xbf16> to vector<16x128xbf16>
    %c5 = arith.constant 5 : index
    %c0_47 = arith.constant 0 : index
    %c0_48 = arith.constant 0 : index
    %85 = vector.load %arg7[%c5, %c0_47, %c0_48] : memref<16x128x128xbf16, #tpu.memory_space<vmem>>, vector<1x128x128xbf16>
    %86 = vector.shape_cast %85 : vector<1x128x128xbf16> to vector<128x128xbf16>
    %cst_49 = arith.constant dense<0.000000e+00> : vector<16x128xf32>
    %87 = tpu.matmul %84, %86, %cst_49 {dimension_numbers = #tpu.dot_dimension_numbers<[1], [0], [0], [1], [0, 0, 1, 1], [], []>} : vector<16x128xbf16>, vector<128x128xbf16>, vector<16x128xf32> -> vector<16x128xf32>
    %88 = arith.addf %82, %87 : vector<16x128xf32>
    %89 = vector.extract_strided_slice %51 {offsets = [6, 0, 0], sizes = [1, 16, 128], strides = [1, 1, 1]} : vector<16x16x128xbf16> to vector<1x16x128xbf16>
    %90 = vector.shape_cast %89 : vector<1x16x128xbf16> to vector<16x128xbf16>
    %c6 = arith.constant 6 : index
    %c0_50 = arith.constant 0 : index
    %c0_51 = arith.constant 0 : index
    %91 = vector.load %arg7[%c6, %c0_50, %c0_51] : memref<16x128x128xbf16, #tpu.memory_space<vmem>>, vector<1x128x128xbf16>
    %92 = vector.shape_cast %91 : vector<1x128x128xbf16> to vector<128x128xbf16>
    %cst_52 = arith.constant dense<0.000000e+00> : vector<16x128xf32>
    %93 = tpu.matmul %90, %92, %cst_52 {dimension_numbers = #tpu.dot_dimension_numbers<[1], [0], [0], [1], [0, 0, 1, 1], [], []>} : vector<16x128xbf16>, vector<128x128xbf16>, vector<16x128xf32> -> vector<16x128xf32>
    %94 = arith.addf %88, %93 : vector<16x128xf32>
    %95 = vector.extract_strided_slice %51 {offsets = [7, 0, 0], sizes = [1, 16, 128], strides = [1, 1, 1]} : vector<16x16x128xbf16> to vector<1x16x128xbf16>
    %96 = vector.shape_cast %95 : vector<1x16x128xbf16> to vector<16x128xbf16>
    %c7 = arith.constant 7 : index
    %c0_53 = arith.constant 0 : index
    %c0_54 = arith.constant 0 : index
    %97 = vector.load %arg7[%c7, %c0_53, %c0_54] : memref<16x128x128xbf16, #tpu.memory_space<vmem>>, vector<1x128x128xbf16>
    %98 = vector.shape_cast %97 : vector<1x128x128xbf16> to vector<128x128xbf16>
    %cst_55 = arith.constant dense<0.000000e+00> : vector<16x128xf32>
    %99 = tpu.matmul %96, %98, %cst_55 {dimension_numbers = #tpu.dot_dimension_numbers<[1], [0], [0], [1], [0, 0, 1, 1], [], []>} : vector<16x128xbf16>, vector<128x128xbf16>, vector<16x128xf32> -> vector<16x128xf32>
    %100 = arith.addf %94, %99 : vector<16x128xf32>
    %101 = vector.extract_strided_slice %51 {offsets = [8, 0, 0], sizes = [1, 16, 128], strides = [1, 1, 1]} : vector<16x16x128xbf16> to vector<1x16x128xbf16>
    %102 = vector.shape_cast %101 : vector<1x16x128xbf16> to vector<16x128xbf16>
    %c8 = arith.constant 8 : index
    %c0_56 = arith.constant 0 : index
    %c0_57 = arith.constant 0 : index
    %103 = vector.load %arg7[%c8, %c0_56, %c0_57] : memref<16x128x128xbf16, #tpu.memory_space<vmem>>, vector<1x128x128xbf16>
    %104 = vector.shape_cast %103 : vector<1x128x128xbf16> to vector<128x128xbf16>
    %cst_58 = arith.constant dense<0.000000e+00> : vector<16x128xf32>
    %105 = tpu.matmul %102, %104, %cst_58 {dimension_numbers = #tpu.dot_dimension_numbers<[1], [0], [0], [1], [0, 0, 1, 1], [], []>} : vector<16x128xbf16>, vector<128x128xbf16>, vector<16x128xf32> -> vector<16x128xf32>
    %106 = arith.addf %100, %105 : vector<16x128xf32>
    %107 = vector.extract_strided_slice %51 {offsets = [9, 0, 0], sizes = [1, 16, 128], strides = [1, 1, 1]} : vector<16x16x128xbf16> to vector<1x16x128xbf16>
    %108 = vector.shape_cast %107 : vector<1x16x128xbf16> to vector<16x128xbf16>
    %c9 = arith.constant 9 : index
    %c0_59 = arith.constant 0 : index
    %c0_60 = arith.constant 0 : index
    %109 = vector.load %arg7[%c9, %c0_59, %c0_60] : memref<16x128x128xbf16, #tpu.memory_space<vmem>>, vector<1x128x128xbf16>
    %110 = vector.shape_cast %109 : vector<1x128x128xbf16> to vector<128x128xbf16>
    %cst_61 = arith.constant dense<0.000000e+00> : vector<16x128xf32>
    %111 = tpu.matmul %108, %110, %cst_61 {dimension_numbers = #tpu.dot_dimension_numbers<[1], [0], [0], [1], [0, 0, 1, 1], [], []>} : vector<16x128xbf16>, vector<128x128xbf16>, vector<16x128xf32> -> vector<16x128xf32>
    %112 = arith.addf %106, %111 : vector<16x128xf32>
    %113 = vector.extract_strided_slice %51 {offsets = [10, 0, 0], sizes = [1, 16, 128], strides = [1, 1, 1]} : vector<16x16x128xbf16> to vector<1x16x128xbf16>
    %114 = vector.shape_cast %113 : vector<1x16x128xbf16> to vector<16x128xbf16>
    %c10 = arith.constant 10 : index
    %c0_62 = arith.constant 0 : index
    %c0_63 = arith.constant 0 : index
    %115 = vector.load %arg7[%c10, %c0_62, %c0_63] : memref<16x128x128xbf16, #tpu.memory_space<vmem>>, vector<1x128x128xbf16>
    %116 = vector.shape_cast %115 : vector<1x128x128xbf16> to vector<128x128xbf16>
    %cst_64 = arith.constant dense<0.000000e+00> : vector<16x128xf32>
    %117 = tpu.matmul %114, %116, %cst_64 {dimension_numbers = #tpu.dot_dimension_numbers<[1], [0], [0], [1], [0, 0, 1, 1], [], []>} : vector<16x128xbf16>, vector<128x128xbf16>, vector<16x128xf32> -> vector<16x128xf32>
    %118 = arith.addf %112, %117 : vector<16x128xf32>
    %119 = vector.extract_strided_slice %51 {offsets = [11, 0, 0], sizes = [1, 16, 128], strides = [1, 1, 1]} : vector<16x16x128xbf16> to vector<1x16x128xbf16>
    %120 = vector.shape_cast %119 : vector<1x16x128xbf16> to vector<16x128xbf16>
    %c11 = arith.constant 11 : index
    %c0_65 = arith.constant 0 : index
    %c0_66 = arith.constant 0 : index
    %121 = vector.load %arg7[%c11, %c0_65, %c0_66] : memref<16x128x128xbf16, #tpu.memory_space<vmem>>, vector<1x128x128xbf16>
    %122 = vector.shape_cast %121 : vector<1x128x128xbf16> to vector<128x128xbf16>
    %cst_67 = arith.constant dense<0.000000e+00> : vector<16x128xf32>
    %123 = tpu.matmul %120, %122, %cst_67 {dimension_numbers = #tpu.dot_dimension_numbers<[1], [0], [0], [1], [0, 0, 1, 1], [], []>} : vector<16x128xbf16>, vector<128x128xbf16>, vector<16x128xf32> -> vector<16x128xf32>
    %124 = arith.addf %118, %123 : vector<16x128xf32>
    %125 = vector.extract_strided_slice %51 {offsets = [12, 0, 0], sizes = [1, 16, 128], strides = [1, 1, 1]} : vector<16x16x128xbf16> to vector<1x16x128xbf16>
    %126 = vector.shape_cast %125 : vector<1x16x128xbf16> to vector<16x128xbf16>
    %c12 = arith.constant 12 : index
    %c0_68 = arith.constant 0 : index
    %c0_69 = arith.constant 0 : index
    %127 = vector.load %arg7[%c12, %c0_68, %c0_69] : memref<16x128x128xbf16, #tpu.memory_space<vmem>>, vector<1x128x128xbf16>
    %128 = vector.shape_cast %127 : vector<1x128x128xbf16> to vector<128x128xbf16>
    %cst_70 = arith.constant dense<0.000000e+00> : vector<16x128xf32>
    %129 = tpu.matmul %126, %128, %cst_70 {dimension_numbers = #tpu.dot_dimension_numbers<[1], [0], [0], [1], [0, 0, 1, 1], [], []>} : vector<16x128xbf16>, vector<128x128xbf16>, vector<16x128xf32> -> vector<16x128xf32>
    %130 = arith.addf %124, %129 : vector<16x128xf32>
    %131 = vector.extract_strided_slice %51 {offsets = [13, 0, 0], sizes = [1, 16, 128], strides = [1, 1, 1]} : vector<16x16x128xbf16> to vector<1x16x128xbf16>
    %132 = vector.shape_cast %131 : vector<1x16x128xbf16> to vector<16x128xbf16>
    %c13 = arith.constant 13 : index
    %c0_71 = arith.constant 0 : index
    %c0_72 = arith.constant 0 : index
    %133 = vector.load %arg7[%c13, %c0_71, %c0_72] : memref<16x128x128xbf16, #tpu.memory_space<vmem>>, vector<1x128x128xbf16>
    %134 = vector.shape_cast %133 : vector<1x128x128xbf16> to vector<128x128xbf16>
    %cst_73 = arith.constant dense<0.000000e+00> : vector<16x128xf32>
    %135 = tpu.matmul %132, %134, %cst_73 {dimension_numbers = #tpu.dot_dimension_numbers<[1], [0], [0], [1], [0, 0, 1, 1], [], []>} : vector<16x128xbf16>, vector<128x128xbf16>, vector<16x128xf32> -> vector<16x128xf32>
    %136 = arith.addf %130, %135 : vector<16x128xf32>
    %137 = vector.extract_strided_slice %51 {offsets = [14, 0, 0], sizes = [1, 16, 128], strides = [1, 1, 1]} : vector<16x16x128xbf16> to vector<1x16x128xbf16>
    %138 = vector.shape_cast %137 : vector<1x16x128xbf16> to vector<16x128xbf16>
    %c14 = arith.constant 14 : index
    %c0_74 = arith.constant 0 : index
    %c0_75 = arith.constant 0 : index
    %139 = vector.load %arg7[%c14, %c0_74, %c0_75] : memref<16x128x128xbf16, #tpu.memory_space<vmem>>, vector<1x128x128xbf16>
    %140 = vector.shape_cast %139 : vector<1x128x128xbf16> to vector<128x128xbf16>
    %cst_76 = arith.constant dense<0.000000e+00> : vector<16x128xf32>
    %141 = tpu.matmul %138, %140, %cst_76 {dimension_numbers = #tpu.dot_dimension_numbers<[1], [0], [0], [1], [0, 0, 1, 1], [], []>} : vector<16x128xbf16>, vector<128x128xbf16>, vector<16x128xf32> -> vector<16x128xf32>
    %142 = arith.addf %136, %141 : vector<16x128xf32>
    %143 = vector.extract_strided_slice %51 {offsets = [15, 0, 0], sizes = [1, 16, 128], strides = [1, 1, 1]} : vector<16x16x128xbf16> to vector<1x16x128xbf16>
    %144 = vector.shape_cast %143 : vector<1x16x128xbf16> to vector<16x128xbf16>
    %c15 = arith.constant 15 : index
    %c0_77 = arith.constant 0 : index
    %c0_78 = arith.constant 0 : index
    %145 = vector.load %arg7[%c15, %c0_77, %c0_78] : memref<16x128x128xbf16, #tpu.memory_space<vmem>>, vector<1x128x128xbf16>
    %146 = vector.shape_cast %145 : vector<1x128x128xbf16> to vector<128x128xbf16>
    %cst_79 = arith.constant dense<0.000000e+00> : vector<16x128xf32>
    %147 = tpu.matmul %144, %146, %cst_79 {dimension_numbers = #tpu.dot_dimension_numbers<[1], [0], [0], [1], [0, 0, 1, 1], [], []>} : vector<16x128xbf16>, vector<128x128xbf16>, vector<16x128xf32> -> vector<16x128xf32>
    %148 = arith.addf %142, %147 : vector<16x128xf32>
    %c0_80 = arith.constant 0 : index
    %c0_81 = arith.constant 0 : index
    %149 = vector.load %arg8[%c0_80, %c0_81] : memref<1x128xf32, #tpu.memory_space<vmem>>, vector<1x128xf32>
    %150 = vector.broadcast %149 : vector<1x128xf32> to vector<16x128xf32>
    %151 = arith.addf %148, %150 : vector<16x128xf32>
    %c0_82 = arith.constant 0 : index
    %c0_83 = arith.constant 0 : index
    %152 = vector.load %arg9[%c0_82, %c0_83] : memref<16x128xf32, #tpu.memory_space<vmem>>, vector<16x128xf32>
    tpu.vector_store %arg9[%c0_82, %c0_83], %151 {strides = array<i32>} : memref<16x128xf32, #tpu.memory_space<vmem>>, vector<16x128xf32>,
    return
  }
  func.func @transform_0(%arg0: i32) -> (i32, i32, i32) {
    %c0_i32 = arith.constant 0 : i32
    %c0_i32_0 = arith.constant 0 : i32
    %c0_i32_1 = arith.constant 0 : i32
    return %c0_i32, %arg0, %c0_i32_0 : i32, i32, i32
  }
  func.func @transform_1(%arg0: i32) -> (i32, i32) {
    %c0_i32 = arith.constant 0 : i32
    %c0_i32_0 = arith.constant 0 : i32
    %c0_i32_1 = arith.constant 0 : i32
    return %c0_i32, %c0_i32_0 : i32, i32
  }
  func.func @transform_2(%arg0: i32) -> (i32, i32) {
    %c0_i32 = arith.constant 0 : i32
    %c0_i32_0 = arith.constant 0 : i32
    %c0_i32_1 = arith.constant 0 : i32
    return %c0_i32, %c0_i32_0 : i32, i32
  }
  func.func @transform_3(%arg0: i32) -> (i32, i32) {
    %c0_i32 = arith.constant 0 : i32
    %c0_i32_0 = arith.constant 0 : i32
    %c0_i32_1 = arith.constant 0 : i32
    return %c0_i32, %c0_i32_0 : i32, i32
  }
  func.func @transform_4(%arg0: i32) -> (i32, i32, i32) {
    %c0_i32 = arith.constant 0 : i32
    %c0_i32_0 = arith.constant 0 : i32
    %c0_i32_1 = arith.constant 0 : i32
    %c0_i32_2 = arith.constant 0 : i32
    return %c0_i32, %c0_i32_0, %c0_i32_1 : i32, i32, i32
  }
  func.func @transform_5(%arg0: i32) -> (i32, i32) {
    %c0_i32 = arith.constant 0 : i32
    %c0_i32_0 = arith.constant 0 : i32
    %c0_i32_1 = arith.constant 0 : i32
    return %c0_i32, %c0_i32_0 : i32, i32
  }
  func.func @transform_6(%arg0: i32) -> (i32, i32, i32) {
    %c0_i32 = arith.constant 0 : i32
    %c0_i32_0 = arith.constant 0 : i32
    %c0_i32_1 = arith.constant 0 : i32
    %c0_i32_2 = arith.constant 0 : i32
    return %c0_i32, %c0_i32_0, %c0_i32_1 : i32, i32, i32
  }
  func.func @transform_7(%arg0: i32) -> (i32, i32) {
    %c0_i32 = arith.constant 0 : i32
    %c0_i32_0 = arith.constant 0 : i32
    %c0_i32_1 = arith.constant 0 : i32
    return %c0_i32, %c0_i32_0 : i32, i32
  }
  func.func @transform_8(%arg0: i32) -> (i32, i32) {
    %c0_i32 = arith.constant 0 : i32
    %c0_i32_0 = arith.constant 0 : i32
    return %arg0, %c0_i32 : i32, i32
  }
}

</mosaic_0001>

<bundles_post_ra>
// kernel: encoder_forward.1
= control target key start
LH: loop header
LB: loop body
LE: loop exit
PB: predicated region body
PF: predicated region fallthrough
CT: control target
= control target key end

     0   :  { %s4693_s27 = smov 0   ;;  %s4695_s28 = smov 0   ;;  %s5675_s0 = inlined_call_operand.vmem [shape: bf16[16,32,256], index: 0, kind: input, shape index: {}]   ;;  %s5676_s1 = inlined_call_operand.vmem [shape: bf16[128,128], index: 1, kind: input, shape index: {}]   ;;  %s5677_s2 = inlined_call_operand.vmem [shape: bf16[128,128], index: 2, kind: input, shape index: {}]   ;;  %s5678_s3 = inlined_call_operand.vmem [shape: f32[1,128], index: 3, kind: input, shape index: {}]   ;;  %s5679_s4 = inlined_call_operand.vmem [shape: bf16[3,128,128], index: 4, kind: input, shape index: {}]   ;;  %s5680_s5 = inlined_call_operand.vmem [shape: f32[1,128], index: 5, kind: input, shape index: {}]   ;;  %s5681_s6 = inlined_call_operand.vmem [shape: bf16[16,128,128], index: 6, kind: input, shape index: {}]   ;;  %s5682_s7 = inlined_call_operand.vmem [shape: f32[1,128], index: 7, kind: input, shape index: {}]   ;;  %s5683_s8 = inlined_call_operand.vmem [shape: f32[32,128], index: 8, kind: output, shape index: {}]  }
   0x1   :  { %s4697_s29 = smov 0  }
   0x2 LB: > { %s3387_s30 = sadd.s32 4294967295, %s4646_s29   ;;  %s4710_s9 = sadd.s32 1, %s4646_s29   ;;  %s4646_s29 = sphi %s4697_s29, %s5686_s29   ;;  %s4642_s28 = sphi %s4695_s28, %s5685_s28   ;;  %s4638_s27 = sphi %s4693_s27, %s5684_s27  }
   0x3   : > { %s22_s10 = ssub.s32 %s4646_s29, %s4710_s9  ;;  %s25_s11 = sadd.s32 1, %s4642_s28 }
   0x4   : > { %p23_p0 = scmp.eq.s32.totalorder %s22_s10, 0  ;;  %p32_p1 = scmp.ne.s32.totalorder %s4642_s28, %s4638_s27 }
   0x5   : > { %p33_p2 = scmp.eq.s32.totalorder %s4646_s29, 0  ;;  %p3390_p4 = scmp.ge.s32.totalorder %s4646_s29, 2 }
   0x6   : > { %s4719_s12 = scalar_select %p23_p0, %s4642_s28, %s25_s11  }
   0x7   : > { %p34_p3 = por %p33_p2, %p32_p1  ;;  %252 = sbr.rel (%p3390_p4) target bundleno = 48 (0x30), region = 44 }
   0xc   : > { %255 = sbr.rel (!%p34_p3) target bundleno = 48 (0x30), region = 48  ;;  %s257_s13 = sand.u32 (%p34_p3), 1, %s4642_s28  }
   0xd   : > { %s4410_s14 = sshll.u32 (%p34_p3), %s4646_s29, 4  ;;  %s3391_s15 = sshll.u32 (%p34_p3), %s257_s13, 8 }
   0xe   : > { %s4727_s18 = scalar_lea.vmem (%p34_p3), %s5675_s0, %s4410_s14  ;;  %s4732_s19 = scalar_lea.vmem (%p34_p3), [#allocation2], %s3391_s15 }
   0xf   : > { %v354_v0 = vld [vmem:[%s4727_s18] sm:$0xff] (%p34_p3)  ;;  %v356_v1 = vld [vmem:[%s4727_s18 + $0x8] sm:$0xff] (%p34_p3) }
  0x10   : > { %v358_v2 = vld [vmem:[%s4727_s18 + $0x20] sm:$0xff] (%p34_p3)  ;;  %355 = vst [vmem:[%s4732_s19] sm:$0xff] (%p34_p3), %v354_v0  ;;  %v360_v3 = vld [vmem:[%s4727_s18 + $0x28] sm:$0xff] (%p34_p3) }
  0x11   : > { %357 = vst [vmem:[%s4732_s19 + $0x8] sm:$0xff] %v356_v1  ;;  %v362_v4 = vld [vmem:[%s4727_s18 + $0x40] sm:$0xff]  ;;  %v364_v5 = vld [vmem:[%s4727_s18 + $0x48] sm:$0xff] }
  0x12   : > { %359 = vst [vmem:[%s4732_s19 + $0x10] sm:$0xff] %v358_v2  ;;  %v366_v6 = vld [vmem:[%s4727_s18 + $0x60] sm:$0xff]  ;;  %v368_v7 = vld [vmem:[%s4727_s18 + $0x68] sm:$0xff] }
  0x13   : > { %361 = vst [vmem:[%s4732_s19 + $0x18] sm:$0xff] %v360_v3  ;;  %v370_v8 = vld [vmem:[%s4727_s18 + $0x80] sm:$0xff]  ;;  %v372_v9 = vld [vmem:[%s4727_s18 + $0x88] sm:$0xff] }
  0x14   : > { %363 = vst [vmem:[%s4732_s19 + $0x20] sm:$0xff] %v362_v4  ;;  %v374_v10 = vld [vmem:[%s4727_s18 + $0xa0] sm:$0xff]  ;;  %v376_v11 = vld [vmem:[%s4727_s18 + $0xa8] sm:$0xff] }
  0x15   : > { %365 = vst [vmem:[%s4732_s19 + $0x28] sm:$0xff] %v364_v5  ;;  %v378_v12 = vld [vmem:[%s4727_s18 + $0xc0] sm:$0xff]  ;;  %v380_v13 = vld [vmem:[%s4727_s18 + $0xc8] sm:$0xff] }
  0x16   : > { %367 = vst [vmem:[%s4732_s19 + $0x30] sm:$0xff] %v366_v6  ;;  %v382_v14 = vld [vmem:[%s4727_s18 + $0xe0] sm:$0xff]  ;;  %v384_v15 = vld [vmem:[%s4727_s18 + $0xe8] sm:$0xff] }
  0x17   : > { %369 = vst [vmem:[%s4732_s19 + $0x38] sm:$0xff] %v368_v7  ;;  %v386_v16 = vld [vmem:[%s4727_s18 + $0x100] sm:$0xff]  ;;  %v388_v17 = vld [vmem:[%s4727_s18 + $0x108] sm:$0xff] }
  0x18   : > { %371 = vst [vmem:[%s4732_s19 + $0x40] sm:$0xff] %v370_v8  ;;  %v390_v18 = vld [vmem:[%s4727_s18 + $0x120] sm:$0xff]  ;;  %v392_v19 = vld [vmem:[%s4727_s18 + $0x128] sm:$0xff] }
  0x19   : > { %373 = vst [vmem:[%s4732_s19 + $0x48] sm:$0xff] %v372_v9  ;;  %v394_v20 = vld [vmem:[%s4727_s18 + $0x140] sm:$0xff]  ;;  %v396_v21 = vld [vmem:[%s4727_s18 + $0x148] sm:$0xff] }
  0x1a   : > { %375 = vst [vmem:[%s4732_s19 + $0x50] sm:$0xff] %v374_v10  ;;  %v398_v22 = vld [vmem:[%s4727_s18 + $0x160] sm:$0xff]  ;;  %v400_v23 = vld [vmem:[%s4727_s18 + $0x168] sm:$0xff] }
  0x1b   : > { %377 = vst [vmem:[%s4732_s19 + $0x58] sm:$0xff] %v376_v11  ;;  %v402_v24 = vld [vmem:[%s4727_s18 + $0x180] sm:$0xff]  ;;  %v404_v25 = vld [vmem:[%s4727_s18 + $0x188] sm:$0xff] }
  0x1c   : > { %379 = vst [vmem:[%s4732_s19 + $0x60] sm:$0xff] %v378_v12  ;;  %v406_v26 = vld [vmem:[%s4727_s18 + $0x1a0] sm:$0xff]  ;;  %v408_v27 = vld [vmem:[%s4727_s18 + $0x1a8] sm:$0xff] }
  0x1d   : > { %381 = vst [vmem:[%s4732_s19 + $0x68] sm:$0xff] %v380_v13  ;;  %v410_v28 = vld [vmem:[%s4727_s18 + $0x1c0] sm:$0xff]  ;;  %v412_v29 = vld [vmem:[%s4727_s18 + $0x1c8] sm:$0xff] }
  0x1e   : > { %383 = vst [vmem:[%s4732_s19 + $0x70] sm:$0xff] %v382_v14  ;;  %v414_v30 = vld [vmem:[%s4727_s18 + $0x1e0] sm:$0xff]  ;;  %v416_v31 = vld [vmem:[%s4727_s18 + $0x1e8] sm:$0xff] }
  0x1f   : > { %385 = vst [vmem:[%s4732_s19 + $0x78] sm:$0xff] %v384_v15 }
  0x20   : > { %387 = vst [vmem:[%s4732_s19 + $0x80] sm:$0xff] %v386_v16 }
  0x21   : > { %389 = vst [vmem:[%s4732_s19 + $0x88] sm:$0xff] %v388_v17 }
  0x22   : > { %391 = vst [vmem:[%s4732_s19 + $0x90] sm:$0xff] %v390_v18 }
  0x23   : > { %393 = vst [vmem:[%s4732_s19 + $0x98] sm:$0xff] %v392_v19 }
  0x24   : > { %395 = vst [vmem:[%s4732_s19 + $0xa0] sm:$0xff] %v394_v20 }
  0x25   : > { %397 = vst [vmem:[%s4732_s19 + $0xa8] sm:$0xff] %v396_v21 }
  0x26   : > { %399 = vst [vmem:[%s4732_s19 + $0xb0] sm:$0xff] %v398_v22 }
  0x27   : > { %401 = vst [vmem:[%s4732_s19 + $0xb8] sm:$0xff] %v400_v23 }
  0x28   : > { %403 = vst [vmem:[%s4732_s19 + $0xc0] sm:$0xff] %v402_v24 }
  0x29   : > { %405 = vst [vmem:[%s4732_s19 + $0xc8] sm:$0xff] %v404_v25 }
  0x2a   : > { %407 = vst [vmem:[%s4732_s19 + $0xd0] sm:$0xff] %v406_v26 }
  0x2b   : > { %409 = vst [vmem:[%s4732_s19 + $0xd8] sm:$0xff] %v408_v27 }
  0x2c   : > { %411 = vst [vmem:[%s4732_s19 + $0xe0] sm:$0xff] %v410_v28 }
  0x2d   : > { %413 = vst [vmem:[%s4732_s19 + $0xe8] sm:$0xff] %v412_v29 }
  0x2e   : > { %415 = vst [vmem:[%s4732_s19 + $0xf0] sm:$0xff] %v414_v30 }
  0x2f   : > { %417 = vst [vmem:[%s4732_s19 + $0xf8] sm:$0xff] %v416_v31 }
  0x30 PF: > { %p3395_p5 = scmp.ge.s32.totalorder %s4646_s29, 1  ;;  %p422_p6 = scmp.lt.s32.totalorder %s4646_s29, 3 }
  0x32   : > { %p423_p7 = pnand %p3395_p5, %p422_p6 }
  0x33   : > { %s429_s16 = sand.u32 (!%p423_p7), 1, %s4638_s27   ;;  %s3397_s14 = sshll.u32 (!%p423_p7), %s3387_s30, 1 }
  0x34   : > { %426 = sbr.rel (%p423_p7) target bundleno = 911 (0x38f), region = 86  ;;  %s3396_s21 = sshll.u32 (!%p423_p7), %s429_s16, 8 }
  0x35   : > { %s4834_s13 = scalar_lea.vmem (!%p423_p7), [#allocation2], %s3396_s21  ;;  %p464_p8 = scmp.lt.s32.totalorder (!%p423_p7), %s3397_s14, 3 }
  0x39   : > { %v4434_v32 = vld [vmem:[%s5676_s1 + $0x38] sm:$0xff]  ;;  %v4433_v34 = vld [vmem:[%s5676_s1 + $0x30] sm:$0xff]  ;;  %v4432_v36 = vld [vmem:[%s5676_s1 + $0x28] sm:$0xff]  ;;  %s5688_s14 = smov (!%p464_p8, %s3397_s14), 3 }
  0x3a   : > { %v4442_v33 = vld [vmem:[%s5677_s2 + $0x38] sm:$0xff]  ;;  %710 = vmatpush.bf16.msra.mxu0 %v4434_v32  ;;  %v4441_v35 = vld [vmem:[%s5677_s2 + $0x30] sm:$0xff]  ;;  %1087 = vmatpush.bf16.msra.mxu3 %v4434_v32  ;;  %v4440_v37 = vld [vmem:[%s5677_s2 + $0x28] sm:$0xff]  ;;  %s3398_s15 = sshll.u32 %s5688_s14, 3 }
  0x3b   : > { %911 = vmatpush.bf16.msra.mxu1 %v4442_v33  ;;  %1000 = vmatpush.bf16.msra.mxu2 %v4442_v33  ;;  %v4431_v38 = vld [vmem:[%s5676_s1 + $0x20] sm:$0xff]  ;;  %v4430_v40 = vld [vmem:[%s5676_s1 + $0x18] sm:$0xff]  ;;  %v4429_v42 = vld [vmem:[%s5676_s1 + $0x10] sm:$0xff]  ;;  %s467_s18 = scalar_lea.vmem %s5683_s8, %s3398_s15 }
  0x3c   : > { %v4439_v39 = vld [vmem:[%s5677_s2 + $0x20] sm:$0xff]  ;;  %v4438_v41 = vld [vmem:[%s5677_s2 + $0x18] sm:$0xff]  ;;  %v4437_v43 = vld [vmem:[%s5677_s2 + $0x10] sm:$0xff] }
  0x3d   : > { %v469_v44 = vld [vmem:[%s4834_s13] sm:$0xff]  ;;  %v470_v45 = vld [vmem:[%s4834_s13 + $0x8] sm:$0xff]  ;;  %v4466_v56 = vld [vmem:[%s5679_s4 + $0xb8] sm:$0xff] }
  0x3e   : > { %711 = vmatpush.bf16.msra.mxu0 %v4433_v34  ;;  %1088 = vmatpush.bf16.msra.mxu3 %v4433_v34  ;;  %v533_v46 = vrot.slane %v469_v44, 4  ;;  %v534_v47 = vrot.slane %v470_v45, 4  ;;  %v4428_v48 = vld [vmem:[%s5676_s1 + $0x8] sm:$0xff]  ;;  %v4427_v50 = vld [vmem:[%s5676_s1] sm:$0xff]  ;;  %v4458_v57 = vld [vmem:[%s5679_s4 + $0x78] sm:$0xff] }
  0x3f   : > { %912 = vmatpush.bf16.msra.mxu1 %v4441_v35  ;;  %1001 = vmatpush.bf16.msra.mxu2 %v4441_v35  ;;  %v4436_v49 = vld [vmem:[%s5677_s2 + $0x8] sm:$0xff]  ;;  %v4435_v53 = vld [vmem:[%s5677_s2] sm:$0xff]  ;;  %v4450_v60 = vld [vmem:[%s5679_s4 + $0x38] sm:$0xff] }
  0x40   : > { %v598_v51 = vunpack.c.l.b16 %v533_v46  ;;  %v599_v52 = vunpack.c.l.b16 %v534_v47  ;;  %v3433_v54 = vld [vmem:[%s4834_s13] sm:$0xf]  ;;  %v4411_v55 = vld [vmem:[%s4834_s13 + $0x4] sm:$0xf0]  ;;  %v471_v61 = vld [vmem:[%s4834_s13 + $0x10] sm:$0xff] }
  0x41   : > { %v3434_v59 = vor.u32 %v4411_v55, %v3433_v54  ;;  %v472_v62 = vld [vmem:[%s4834_s13 + $0x18] sm:$0xff]  ;;  %v4465_v63 = vld [vmem:[%s5679_s4 + $0xb0] sm:$0xff]  ;;  %v535_v1 = vrot.slane %v471_v61, 4  ;;  %v473_v9 = vld [vmem:[%s4834_s13 + $0x20] sm:$0xff] }
  0x42   : > { %712 = vmatpush.bf16.msra.mxu0 %v4432_v36  ;;  %1089 = vmatpush.bf16.msra.mxu3 %v4432_v36  ;;  %v630_v58 = vpack.c.b16 %v599_v52, %v598_v51  ;;  %v4457_v0 = vld [vmem:[%s5679_s4 + $0x70] sm:$0xff]  ;;  %v536_v2 = vrot.slane %v472_v62, 4  ;;  %v4412_v6 = vld [vmem:[%s4834_s13 + $0x14] sm:$0xf0]  ;;  %v474_v10 = vld [vmem:[%s4834_s13 + $0x28] sm:$0xff]  ;;  %v537_v12 = vrot.slane %v473_v9, 4 }
  0x43   : > { %913 = vmatpush.bf16.msra.mxu1 %v4440_v37  ;;  %1002 = vmatpush.bf16.msra.mxu2 %v4440_v37  ;;  %v600_v3 = vunpack.c.l.b16 %v535_v1  ;;  %v3437_v5 = vld [vmem:[%s4834_s13 + $0x10] sm:$0xf]  ;;  %v538_v13 = vrot.slane %v474_v10, 4  ;;  %v3441_v16 = vld [vmem:[%s4834_s13 + $0x20] sm:$0xf]  ;;  %v476_v21 = vld [vmem:[%s4834_s13 + $0x38] sm:$0xff] }
  0x44   : > { %v601_v4 = vunpack.c.l.b16 %v536_v2  ;;  %v3438_v8 = vor.u32 %v4412_v6, %v3437_v5  ;;  %v4449_v11 = vld [vmem:[%s5679_s4 + $0x30] sm:$0xff]  ;;  %v602_v14 = vunpack.c.l.b16 %v537_v12  ;;  %v4413_v17 = vld [vmem:[%s4834_s13 + $0x24] sm:$0xf0]  ;;  %v540_v25 = vrot.slane %v476_v21, 4  ;;  %v4414_v29 = vld [vmem:[%s4834_s13 + $0x34] sm:$0xf0] }
  0x45   : > { %v603_v15 = vunpack.c.l.b16 %v538_v13  ;;  %v3442_v19 = vor.u32 %v4413_v17, %v3441_v16  ;;  %v475_v20 = vld [vmem:[%s4834_s13 + $0x30] sm:$0xff]  ;;  %v4464_v22 = vld [vmem:[%s5679_s4 + $0xa8] sm:$0xff]  ;;  %v477_v32 = vld [vmem:[%s4834_s13 + $0x40] sm:$0xff] }
  0x46   : > { %713 = vmatpush.bf16.msra.mxu0 %v4431_v38  ;;  %1090 = vmatpush.bf16.msra.mxu3 %v4431_v38  ;;  %v631_v7 = vpack.c.b16 %v601_v4, %v600_v3  ;;  %v4456_v23 = vld [vmem:[%s5679_s4 + $0x68] sm:$0xff]  ;;  %v539_v24 = vrot.slane %v475_v20, 4  ;;  %v605_v27 = vunpack.c.l.b16 %v540_v25  ;;  %v3445_v28 = vld [vmem:[%s4834_s13 + $0x30] sm:$0xf]  ;;  %v541_v35 = vrot.slane %v477_v32, 4  ;;  %v480_v44 = vld [vmem:[%s4834_s13 + $0x58] sm:$0xff] }
  0x47   : > { %914 = vmatpush.bf16.msra.mxu1 %v4439_v39  ;;  %1003 = vmatpush.bf16.msra.mxu2 %v4439_v39  ;;  %v632_v18 = vpack.c.b16 %v603_v15, %v602_v14  ;;  %v3446_v31 = vor.u32 %v4414_v29, %v3445_v28  ;;  %v478_v33 = vld [vmem:[%s4834_s13 + $0x48] sm:$0xff]  ;;  %v3449_v39 = vld [vmem:[%s4834_s13 + $0x40] sm:$0xf]  ;;  %v3453_v51 = vld [vmem:[%s4834_s13 + $0x50] sm:$0xf] }
  0x48   : > { %v604_v26 = vunpack.c.l.b16 %v539_v24  ;;  %v4448_v34 = vld [vmem:[%s5679_s4 + $0x28] sm:$0xff]  ;;  %v542_v36 = vrot.slane %v478_v33, 4  ;;  %v606_v37 = vunpack.c.l.b16 %v541_v35  ;;  %v4463_v45 = vld [vmem:[%s5679_s4 + $0xa0] sm:$0xff]  ;;  %v4416_v52 = vld [vmem:[%s4834_s13 + $0x54] sm:$0xf0] }
  0x49   : > { %v4455_v46 = vld [vmem:[%s5679_s4 + $0x60] sm:$0xff]  ;;  %v3454_v54 = vor.u32 %v4416_v52, %v3453_v51  ;;  %v483_v2 = vld [vmem:[%s4834_s13 + $0x70] sm:$0xff]  ;;  %v484_v3 = vld [vmem:[%s4834_s13 + $0x78] sm:$0xff] }
  0x4a   : > { %714 = vmatpush.bf16.msra.mxu0 %v4430_v40  ;;  %1091 = vmatpush.bf16.msra.mxu3 %v4430_v40  ;;  %v633_v30 = vpack.c.b16 %v605_v27, %v604_v26  ;;  %v607_v38 = vunpack.c.l.b16 %v542_v36  ;;  %v4415_v40 = vld [vmem:[%s4834_s13 + $0x44] sm:$0xf0]  ;;  %v481_v55 = vld [vmem:[%s4834_s13 + $0x60] sm:$0xff]  ;;  %v547_v4 = vrot.slane %v483_v2, 4  ;;  %v548_v5 = vrot.slane %v484_v3, 4  ;;  %v4462_v12 = vld [vmem:[%s5679_s4 + $0x98] sm:$0xff] }
  0x4b   : > { %915 = vmatpush.bf16.msra.mxu1 %v4438_v41  ;;  %1004 = vmatpush.bf16.msra.mxu2 %v4438_v41  ;;  %v3457_v62 = vld [vmem:[%s4834_s13 + $0x60] sm:$0xf]  ;;  %v4418_v9 = vld [vmem:[%s4834_s13 + $0x74] sm:$0xf0]  ;;  %v486_v15 = vld [vmem:[%s4834_s13 + $0x88] sm:$0xff] }
  0x4c   : > { %v634_v41 = vpack.c.b16 %v607_v38, %v606_v37  ;;  %v612_v6 = vunpack.c.l.b16 %v547_v4  ;;  %v4454_v13 = vld [vmem:[%s5679_s4 + $0x58] sm:$0xff]  ;;  %v485_v14 = vld [vmem:[%s4834_s13 + $0x80] sm:$0xff]  ;;  %v550_v17 = vrot.slane %v486_v15, 4  ;;  %v4419_v21 = vld [vmem:[%s4834_s13 + $0x84] sm:$0xf0] }
  0x4d   : > { %v549_v16 = vrot.slane %v485_v14, 4  ;;  %v3465_v20 = vld [vmem:[%s4834_s13 + $0x80] sm:$0xf]  ;;  %v487_v28 = vld [vmem:[%s4834_s13 + $0x90] sm:$0xff]  ;;  %v488_v29 = vld [vmem:[%s4834_s13 + $0x98] sm:$0xff] }
  0x4e   : > { %715 = vmatpush.bf16.msra.mxu0 %v4429_v42  ;;  %1092 = vmatpush.bf16.msra.mxu3 %v4429_v42  ;;  %v3450_v42 = vor.u32 %v4415_v40, %v3449_v39  ;;  %v3466_v24 = vor.u32 %v4419_v21, %v3465_v20  ;;  %v551_v33 = vrot.slane %v487_v28, 4 }
  0x4f   : > { %916 = vmatpush.bf16.msra.mxu1 %v4437_v43  ;;  %1005 = vmatpush.bf16.msra.mxu2 %v4437_v43  ;;  %v479_v43 = vld [vmem:[%s4834_s13 + $0x50] sm:$0xff] }
  0x50   : > { %v543_v47 = vrot.slane %v479_v43, 4  ;;  %v616_v40 = vunpack.c.l.b16 %v551_v33  ;;  %v4420_v43 = vld [vmem:[%s4834_s13 + $0x94] sm:$0xf0] }
  0x52   : > { %716 = vmatpush.bf16.msra.mxu0 %v4428_v48  ;;  %1093 = vmatpush.bf16.msra.mxu3 %v4428_v48  ;;  %v544_v48 = vrot.slane %v480_v44, 4 }
  0x53   : > { %917 = vmatpush.bf16.msra.mxu1 %v4436_v49  ;;  %1006 = vmatpush.bf16.msra.mxu2 %v4436_v49  ;;  %v608_v49 = vunpack.c.l.b16 %v543_v47  ;;  %v4453_v47 = vld [vmem:[%s5679_s4 + $0x50] sm:$0xff] }
  0x56   : > { %717 = vmatpush.bf16.msra.mxu0 %v4427_v50  ;;  %1094 = vmatpush.bf16.msra.mxu3 %v4427_v50  ;;  %v609_v50 = vunpack.c.l.b16 %v544_v48 }
  0x57   : > { %918 = vmatpush.bf16.msra.mxu1 %v4435_v53  ;;  %1007 = vmatpush.bf16.msra.mxu2 %v4435_v53 }
  0x58   : > { %v635_v53 = vpack.c.b16 %v609_v50, %v608_v49 }
  0x59   : > { %718 = vmatmul.bf16.vlgmr.msra.gmra.mxu0 %v630_v58  ;;  %1095 = vmatmul.bf16.vlgmr.msra.gmra.mxu3 %v3434_v59 }
  0x5a   : > { %1437 = vmatpush.bf16.msrb.mxu0 %v4466_v56  ;;  %919 = vmatmul.bf16.vlgmr.msra.gmra.mxu1 %v3434_v59  ;;  %v482_v56 = vld [vmem:[%s4834_s13 + $0x68] sm:$0xff] }
  0x5b   : > { %1574 = vmatpush.bf16.msrb.mxu1 %v4458_v57  ;;  %1008 = vmatmul.bf16.vlgmr.msra.gmra.mxu2 %v630_v58  ;;  %v4447_v57 = vld [vmem:[%s5679_s4 + $0x20] sm:$0xff]  ;;  %v545_v58 = vrot.slane %v481_v55, 4  ;;  %v546_v59 = vrot.slane %v482_v56, 4 }
  0x5c   : > { %1711 = vmatpush.bf16.msrb.mxu2 %v4450_v60  ;;  %v489_v56 = vld [vmem:[%s4834_s13 + $0xa0] sm:$0xff] }
  0x5d   : > { %v610_v60 = vunpack.c.l.b16 %v545_v58  ;;  %v611_v61 = vunpack.c.l.b16 %v546_v59 }
  0x5e   : > { %1438 = vmatpush.bf16.msrb.mxu0 %v4465_v63  ;;  %v4417_v63 = vld [vmem:[%s4834_s13 + $0x64] sm:$0xf0] }
  0x5f   : > { %1575 = vmatpush.bf16.msrb.mxu1 %v4457_v0  ;;  %v636_v0 = vpack.c.b16 %v611_v61, %v610_v60  ;;  %v3458_v1 = vor.u32 %v4417_v63, %v3457_v62  ;;  %v553_v60 = vrot.slane %v489_v56, 4 }
  0x60   : > { %1712 = vmatpush.bf16.msrb.mxu2 %v4449_v11 }
  0x61   : > { %v618_v3 = vunpack.c.l.b16 %v553_v60 }
  0x62   : > { %1439 = vmatpush.bf16.msrb.mxu0 %v4464_v22  ;;  %v4446_v22 = vld [vmem:[%s5679_s4 + $0x18] sm:$0xff] }
  0x63   : > { %1576 = vmatpush.bf16.msrb.mxu1 %v4456_v23 }
  0x64   : > { %1713 = vmatpush.bf16.msrb.mxu2 %v4448_v34  ;;  %v552_v34 = vrot.slane %v488_v29, 4 }
  0x66   : > { %1440 = vmatpush.bf16.msrb.mxu0 %v4463_v45 }
  0x67   : > { %1577 = vmatpush.bf16.msrb.mxu1 %v4455_v46  ;;  %v4461_v46 = vld [vmem:[%s5679_s4 + $0x90] sm:$0xff] }
  0x68   : > { %1714 = vmatpush.bf16.msrb.mxu2 %v4447_v57  ;;  %v490_v57 = vld [vmem:[%s4834_s13 + $0xa8] sm:$0xff] }
  0x69   : > { %723 = vmatmul.bf16.gmra.mxu0 %v631_v7  ;;  %1100 = vmatmul.bf16.gmra.mxu3 %v3438_v8  ;;  %v554_v61 = vrot.slane %v490_v57, 4 }
  0x6a   : > { %924 = vmatmul.bf16.gmra.mxu1 %v3438_v8  ;;  %v3461_v8 = vld [vmem:[%s4834_s13 + $0x70] sm:$0xf]  ;;  %1441 = vmatpush.bf16.msrb.mxu0 %v4462_v12 }
  0x6b   : > { %1013 = vmatmul.bf16.gmra.mxu2 %v631_v7  ;;  %v613_v7 = vunpack.c.l.b16 %v548_v5  ;;  %v3462_v11 = vor.u32 %v4418_v9, %v3461_v8  ;;  %1578 = vmatpush.bf16.msrb.mxu1 %v4454_v13  ;;  %v619_v4 = vunpack.c.l.b16 %v554_v61 }
  0x6c   : > { %1715 = vmatpush.bf16.msrb.mxu2 %v4446_v22 }
  0x6d   : > { %v637_v10 = vpack.c.b16 %v613_v7, %v612_v6  ;;  %v3473_v6 = vld [vmem:[%s4834_s13 + $0xa0] sm:$0xf]  ;;  %v4421_v7 = vld [vmem:[%s4834_s13 + $0xa4] sm:$0xf0]  ;;  %v640_v13 = vpack.c.b16 %v619_v4, %v618_v3 }
  0x6e   : > { %1442 = vmatpush.bf16.msrb.mxu0 %v4461_v46  ;;  %v3474_v14 = vor.u32 %v4421_v7, %v3473_v6  ;;  %v4452_v46 = vld [vmem:[%s5679_s4 + $0x48] sm:$0xff] }
  0x6f   : > { %1579 = vmatpush.bf16.msrb.mxu1 %v4453_v47 }
  0x73   : > { %1580 = vmatpush.bf16.msrb.mxu1 %v4452_v46 }
  0x79   : > { %728 = vmatmul.bf16.gmra.mxu0 %v632_v18  ;;  %1105 = vmatmul.bf16.gmra.mxu3 %v3442_v19 }
  0x7a   : > { %929 = vmatmul.bf16.gmra.mxu1 %v3442_v19  ;;  %v615_v19 = vunpack.c.l.b16 %v550_v17 }
  0x7b   : > { %1018 = vmatmul.bf16.gmra.mxu2 %v632_v18  ;;  %v614_v18 = vunpack.c.l.b16 %v549_v16 }
  0x7d   : > { %v638_v23 = vpack.c.b16 %v615_v19, %v614_v18 }
  0x89   : > { %733 = vmatmul.bf16.gmra.mxu0 %v633_v30  ;;  %1110 = vmatmul.bf16.gmra.mxu3 %v3446_v31 }
  0x8a   : > { %934 = vmatmul.bf16.gmra.mxu1 %v3446_v31 }
  0x8b   : > { %1023 = vmatmul.bf16.gmra.mxu2 %v633_v30  ;;  %v4934_v30 = vld [vmem:[%s5678_s3] ss:$0 sm:$0xff] }
  0x99   : > { %738 = vmatmul.bf16.gmra.mxu0 %v634_v41  ;;  %1115 = vmatmul.bf16.gmra.mxu3 %v3450_v42 }
  0x9a   : > { %939 = vmatmul.bf16.gmra.mxu1 %v3450_v42  ;;  %v3469_v42 = vld [vmem:[%s4834_s13 + $0x90] sm:$0xf] }
  0x9b   : > { %1028 = vmatmul.bf16.gmra.mxu2 %v634_v41  ;;  %v617_v41 = vunpack.c.l.b16 %v552_v34  ;;  %v3470_v52 = vor.u32 %v4420_v43, %v3469_v42  ;;  %v4422_v42 = vld [vmem:[%s4834_s13 + $0xb4] sm:$0xf0] }
  0x9d   : > { %v639_v51 = vpack.c.b16 %v617_v41, %v616_v40  ;;  %v3477_v41 = vld [vmem:[%s4834_s13 + $0xb0] sm:$0xf] }
  0xa9   : > { %743 = vmatmul.bf16.gmra.mxu0 %v635_v53  ;;  %1120 = vmatmul.bf16.gmra.mxu3 %v3454_v54 }
  0xaa   : > { %944 = vmatmul.bf16.gmra.mxu1 %v3454_v54 }
  0xab   : > { %1033 = vmatmul.bf16.gmra.mxu2 %v635_v53 }
  0xb9   : > { %748 = vmatmul.bf16.gmra.mxu0 %v636_v0  ;;  %1125 = vmatmul.bf16.gmra.mxu3 %v3458_v1 }
  0xba   : > { %949 = vmatmul.bf16.gmra.mxu1 %v3458_v1 }
  0xbb   : > { %1038 = vmatmul.bf16.gmra.mxu2 %v636_v0 }
  0xc9   : > { %753 = vmatmul.bf16.gmra.mxu0 %v637_v10  ;;  %1130 = vmatmul.bf16.gmra.mxu3 %v3462_v11 }
  0xca   : > { %954 = vmatmul.bf16.gmra.mxu1 %v3462_v11 }
  0xcb   : > { %1043 = vmatmul.bf16.gmra.mxu2 %v637_v10  ;;  %v4445_v10 = vld [vmem:[%s5679_s4 + $0x10] sm:$0xff] }
  0xcc   : > { %1716 = vmatpush.bf16.msrb.mxu2 %v4445_v10 }
  0xd6   : > { %v719_v25 = vpop.f32.mrf.mxu0 }
  0xd7   : > { %v920_v26 = vpop.f32.mrf.mxu1 }
  0xd8   : > { %v921_v27 = vadd.f32 %v920_v26, %v719_v25  ;;  %v492_v25 = vld [vmem:[%s4834_s13 + $0xb8] sm:$0xff] }
  0xd9   : > { %758 = vmatmul.bf16.gmra.mxu0 %v638_v23  ;;  %1135 = vmatmul.bf16.gmra.mxu3 %v3466_v24 }
  0xda   : > { %959 = vmatmul.bf16.gmra.mxu1 %v3466_v24  ;;  %v1259_v37 = vadd.f32 %v4934_v30, %v921_v27  ;;  %v491_v24 = vld [vmem:[%s4834_s13 + $0xb0] sm:$0xff] }
  0xdb   : > { %1048 = vmatmul.bf16.gmra.mxu2 %v638_v23  ;;  %v555_v29 = vrot.slane %v491_v24, 4 }
  0xdc   : > { %v4936_v32 = vpop.f32.mrf.mxu3  ;;  %v1291_v44 = vmax.f32 %v1259_v37, 0.0 }
  0xde   : > { %v1009_v31 = vpop.f32.mrf.mxu2  ;;  %v721_v35 = vpop.f32.mrf.mxu0 }
  0xdf   : > { %v922_v36 = vpop.f32.mrf.mxu1 }
  0xe0   : > { %v923_v38 = vadd.f32 %v922_v36, %v721_v35 }
  0xe2   : > { %v1260_v39 = vadd.f32 %v4934_v30, %v923_v38  ;;  %v620_v38 = vunpack.c.l.b16 %v555_v29 }
  0xe4   : > { %v1292_v45 = vmax.f32 %v1260_v39, 0.0  ;;  %v4950_v50 = vpop.f32.mrf.mxu3 }
  0xe6   : > { %v4948_v48 = vpack.c.bf16 %v1292_v45, %v1291_v44  ;;  %v1011_v49 = vpop.f32.mrf.mxu2  ;;  %v724_v53 = vpop.f32.mrf.mxu0  ;;  %v4460_v45 = vld [vmem:[%s5679_s4 + $0x88] sm:$0xff] }
  0xe7   : > { %v925_v54 = vpop.f32.mrf.mxu1  ;;  %1443 = vmatpush.bf16.msrb.mxu0 %v4460_v45 }
  0xe8   : > { %v926_v55 = vadd.f32 %v925_v54, %v724_v53 }
  0xe9   : > { %763 = vmatmul.bf16.gmra.mxu0 %v639_v51  ;;  %1140 = vmatmul.bf16.gmra.mxu3 %v3470_v52 }
  0xea   : > { %964 = vmatmul.bf16.gmra.mxu1 %v3470_v52  ;;  %v1261_v0 = vadd.f32 %v4934_v30, %v926_v55  ;;  %v3478_v52 = vor.u32 %v4422_v42, %v3477_v41 }
  0xeb   : > { %1053 = vmatmul.bf16.gmra.mxu2 %v639_v51 }
  0xec   : > { %v1101_v59 = vpop.f32.mrf.mxu3  ;;  %v1293_v8 = vmax.f32 %v1261_v0, 0.0 }
  0xed   : > { %v1102_v5 = vadd.f32 %v1101_v59, %v1009_v31  ;;  %v556_v31 = vrot.slane %v492_v25, 4 }
  0xee   : > { %v1014_v58 = vpop.f32.mrf.mxu2  ;;  %v726_v62 = vpop.f32.mrf.mxu0 }
  0xef   : > { %v927_v63 = vpop.f32.mrf.mxu1  ;;  %v1181_v16 = vadd.f32 %v4934_v30, %v1102_v5  ;;  %v621_v39 = vunpack.c.l.b16 %v556_v31 }
  0xf0   : > { %v928_v1 = vadd.f32 %v927_v63, %v726_v62  ;;  %v493_v62 = vld [vmem:[%s4834_s13 + $0xc0] sm:$0xff]  ;;  %v494_v63 = vld [vmem:[%s4834_s13 + $0xc8] sm:$0xff] }
  0xf1   : > { %v1213_v22 = vmax.f32 %v1181_v16, 0.0  ;;  %v641_v51 = vpack.c.b16 %v621_v39, %v620_v38  ;;  %v557_v3 = vrot.slane %v493_v62, 4  ;;  %v558_v4 = vrot.slane %v494_v63, 4 }
  0xf2   : > { %v1262_v2 = vadd.f32 %v4934_v30, %v928_v1 }
  0xf3   : > { %v622_v10 = vunpack.c.l.b16 %v557_v3 }
  0xf4   : > { %v1294_v9 = vmax.f32 %v1262_v2, 0.0  ;;  %v1103_v12 = vpop.f32.mrf.mxu3 }
  0xf5   : > { %v1104_v17 = vadd.f32 %v1103_v12, %v1011_v49 }
  0xf6   : > { %v1016_v11 = vpop.f32.mrf.mxu2  ;;  %v4961_v15 = vpack.c.bf16 %v1294_v9, %v1293_v8  ;;  %v729_v18 = vpop.f32.mrf.mxu0 }
  0xf7   : > { %v930_v19 = vpop.f32.mrf.mxu1  ;;  %v1182_v21 = vadd.f32 %v4934_v30, %v1104_v17 }
  0xf8   : > { %v931_v20 = vadd.f32 %v930_v19, %v729_v18  ;;  %v4444_v18 = vld [vmem:[%s5679_s4 + $0x8] sm:$0xff] }
  0xf9   : > { %768 = vmatmul.bf16.gmra.mxu0 %v640_v13  ;;  %v1214_v23 = vmax.f32 %v1182_v21, 0.0  ;;  %1145 = vmatmul.bf16.gmra.mxu3 %v3474_v14 }
  0xfa   : > { %969 = vmatmul.bf16.gmra.mxu1 %v3474_v14  ;;  %v1263_v35 = vadd.f32 %v4934_v30, %v931_v20  ;;  %v4423_v14 = vld [vmem:[%s4834_s13 + $0xc4] sm:$0xf0]  ;;  %1717 = vmatpush.bf16.msrb.mxu2 %v4444_v18 }
  0xfb   : > { %1058 = vmatmul.bf16.gmra.mxu2 %v640_v13  ;;  %v4967_v26 = vpack.c.bf16 %v1214_v23, %v1213_v22  ;;  %v3481_v13 = vld [vmem:[%s4834_s13 + $0xc0] sm:$0xf] }
  0xfc   : > { %v1106_v28 = vpop.f32.mrf.mxu3  ;;  %v1295_v43 = vmax.f32 %v1263_v35, 0.0  ;;  %v3482_v22 = vor.u32 %v4423_v14, %v3481_v13  ;;  %v495_v35 = vld [vmem:[%s4834_s13 + $0xd0] sm:$0xff] }
  0xfd   : > { %v1107_v40 = vadd.f32 %v1106_v28, %v1014_v58 }
  0xfe   : > { %v1019_v27 = vpop.f32.mrf.mxu2  ;;  %v731_v33 = vpop.f32.mrf.mxu0 }
  0xff   : > { %v932_v34 = vpop.f32.mrf.mxu1  ;;  %v1183_v54 = vadd.f32 %v4934_v30, %v1107_v40  ;;  %v559_v40 = vrot.slane %v495_v35, 4 }
 0x100   : > { %v933_v36 = vadd.f32 %v932_v34, %v731_v33 }
 0x101   : > { %v1215_v60 = vmax.f32 %v1183_v54, 0.0  ;;  %v4424_v54 = vld [vmem:[%s4834_s13 + $0xd4] sm:$0xf0] }
 0x102   : > { %v1264_v37 = vadd.f32 %v4934_v30, %v933_v36  ;;  %v496_v36 = vld [vmem:[%s4834_s13 + $0xd8] sm:$0xff] }
 0x103   : > { %v560_v41 = vrot.slane %v496_v36, 4 }
 0x104   : > { %v1296_v44 = vmax.f32 %v1264_v37, 0.0  ;;  %v1108_v49 = vpop.f32.mrf.mxu3 }
 0x105   : > { %v1109_v55 = vadd.f32 %v1108_v49, %v1016_v11  ;;  %v623_v11 = vunpack.c.l.b16 %v558_v4  ;;  %v625_v49 = vunpack.c.l.b16 %v560_v41 }
 0x106   : > { %v1021_v47 = vpop.f32.mrf.mxu2  ;;  %v4979_v53 = vpack.c.bf16 %v1296_v44, %v1295_v43  ;;  %v734_v56 = vpop.f32.mrf.mxu0 }
 0x107   : > { %v935_v57 = vpop.f32.mrf.mxu1  ;;  %v1184_v59 = vadd.f32 %v4934_v30, %v1109_v55  ;;  %v642_v21 = vpack.c.b16 %v623_v11, %v622_v10  ;;  %v498_v10 = vld [vmem:[%s4834_s13 + $0xe8] sm:$0xff] }
 0x108   : > { %v936_v58 = vadd.f32 %v935_v57, %v734_v56  ;;  %v4459_v57 = vld [vmem:[%s5679_s4 + $0x80] sm:$0xff] }
 0x109   : > { %773 = vmatmul.bf16.gmra.mxu0 %v641_v51  ;;  %v1216_v61 = vmax.f32 %v1184_v59, 0.0  ;;  %1150 = vmatmul.bf16.gmra.mxu3 %v3478_v52 }
 0x10a   : > { %974 = vmatmul.bf16.gmra.mxu1 %v3478_v52  ;;  %v1265_v7 = vadd.f32 %v4934_v30, %v936_v58  ;;  %v3485_v52 = vld [vmem:[%s4834_s13 + $0xd0] sm:$0xf]  ;;  %v4451_v58 = vld [vmem:[%s5679_s4 + $0x40] sm:$0xff]  ;;  %1444 = vmatpush.bf16.msrb.mxu0 %v4459_v57 }
 0x10b   : > { %1063 = vmatmul.bf16.gmra.mxu2 %v641_v51  ;;  %v4985_v0 = vpack.c.bf16 %v1216_v61, %v1215_v60  ;;  %v3486_v62 = vor.u32 %v4424_v54, %v3485_v52  ;;  %1581 = vmatpush.bf16.msrb.mxu1 %v4451_v58  ;;  %v4482_v52 = vld [vmem:[%s5681_s6 + $0x78] sm:$0xff] }
 0x10c   : > { %v1111_v2 = vpop.f32.mrf.mxu3  ;;  %v1297_v16 = vmax.f32 %v1265_v7, 0.0  ;;  %2017 = vmatpush.bf16.msrb.mxu3 %v4482_v52 }
 0x10d   : > { %v1112_v12 = vadd.f32 %v1111_v2, %v1019_v27 }
 0x10e   : > { %v1024_v1 = vpop.f32.mrf.mxu2  ;;  %v736_v5 = vpop.f32.mrf.mxu0 }
 0x10f   : > { %v937_v6 = vpop.f32.mrf.mxu1  ;;  %v1185_v24 = vadd.f32 %v4934_v30, %v1112_v12 }
 0x110   : > { %v938_v8 = vadd.f32 %v937_v6, %v736_v5 }
 0x111   : > { %v1217_v33 = vmax.f32 %v1185_v24, 0.0 }
 0x112   : > { %v1266_v9 = vadd.f32 %v4934_v30, %v938_v8 }
 0x114   : > { %v1298_v17 = vmax.f32 %v1266_v9, 0.0  ;;  %v1113_v20 = vpop.f32.mrf.mxu3  ;;  %v497_v9 = vld [vmem:[%s4834_s13 + $0xe0] sm:$0xff] }
 0x115   : > { %v1114_v25 = vadd.f32 %v1113_v20, %v1021_v47  ;;  %v624_v47 = vunpack.c.l.b16 %v559_v40  ;;  %v561_v14 = vrot.slane %v497_v9, 4 }
 0x116   : > { %v1026_v19 = vpop.f32.mrf.mxu2  ;;  %v4994_v23 = vpack.c.bf16 %v1298_v17, %v1297_v16  ;;  %v739_v27 = vpop.f32.mrf.mxu0  ;;  %v562_v16 = vrot.slane %v498_v10, 4 }
 0x117   : > { %v940_v28 = vpop.f32.mrf.mxu1  ;;  %v1186_v31 = vadd.f32 %v4934_v30, %v1114_v25  ;;  %v643_v61 = vpack.c.b16 %v625_v49, %v624_v47  ;;  %v499_v49 = vld [vmem:[%s4834_s13 + $0xf0] sm:$0xff] }
 0x118   : > { %v941_v29 = vadd.f32 %v940_v28, %v739_v27  ;;  %v627_v24 = vunpack.c.l.b16 %v562_v16  ;;  %v3489_v27 = vld [vmem:[%s4834_s13 + $0xe0] sm:$0xf]  ;;  %v4425_v28 = vld [vmem:[%s4834_s13 + $0xe4] sm:$0xf0]  ;;  %v563_v57 = vrot.slane %v499_v49, 4 }
 0x119   : > { %778 = vmatmul.bf16.gmra.mxu0 %v642_v21  ;;  %v1218_v34 = vmax.f32 %v1186_v31, 0.0  ;;  %1155 = vmatmul.bf16.gmra.mxu3 %v3482_v22 }
 0x11a   : > { %979 = vmatmul.bf16.gmra.mxu1 %v3482_v22  ;;  %v1267_v44 = vadd.f32 %v4934_v30, %v941_v29  ;;  %v626_v22 = vunpack.c.l.b16 %v561_v14 }
 0x11b   : > { %1068 = vmatmul.bf16.gmra.mxu2 %v642_v21  ;;  %v5000_v37 = vpack.c.bf16 %v1218_v34, %v1217_v33  ;;  %v4443_v33 = vld [vmem:[%s5679_s4] sm:$0xff] }
 0x11c   : > { %v1116_v39 = vpop.f32.mrf.mxu3  ;;  %v1299_v55 = vmax.f32 %v1267_v44, 0.0  ;;  %v644_v36 = vpack.c.b16 %v627_v24, %v626_v22  ;;  %1718 = vmatpush.bf16.msrb.mxu2 %v4443_v33  ;;  %v1179_v33 = vadd.f32 %v4934_v30, %v4936_v32 }
 0x11d   : > { %v1117_v51 = vadd.f32 %v1116_v39, %v1024_v1  ;;  %v3490_v39 = vor.u32 %v4425_v28, %v3489_v27 }
 0x11e   : > { %v1029_v38 = vpop.f32.mrf.mxu2  ;;  %v741_v42 = vpop.f32.mrf.mxu0 }
 0x11f   : > { %v942_v43 = vpop.f32.mrf.mxu1  ;;  %v1187_v1 = vadd.f32 %v4934_v30, %v1117_v51  ;;  %v500_v51 = vld [vmem:[%s4834_s13 + $0xf8] sm:$0xff] }
 0x120   : > { %v943_v45 = vadd.f32 %v942_v43, %v741_v42  ;;  %v564_v58 = vrot.slane %v500_v51, 4 }
 0x121   : > { %v1219_v7 = vmax.f32 %v1187_v1, 0.0 }
 0x122   : > { %v1268_v46 = vadd.f32 %v4934_v30, %v943_v45 }
 0x124   : > { %v1300_v56 = vmax.f32 %v1268_v46, 0.0  ;;  %v1118_v60 = vpop.f32.mrf.mxu3 }
 0x125   : > { %v1119_v2 = vadd.f32 %v1118_v60, %v1026_v19 }
 0x126   : > { %v1031_v59 = vpop.f32.mrf.mxu2  ;;  %v5012_v63 = vpack.c.bf16 %v1300_v56, %v1299_v55  ;;  %v744_v3 = vpop.f32.mrf.mxu0 }
 0x127   : > { %v945_v4 = vpop.f32.mrf.mxu1  ;;  %v1188_v6 = vadd.f32 %v4934_v30, %v1119_v2  ;;  %v628_v2 = vunpack.c.l.b16 %v563_v57 }
 0x128   : > { %v946_v5 = vadd.f32 %v945_v4, %v744_v3  ;;  %v629_v3 = vunpack.c.l.b16 %v564_v58 }
 0x129   : > { %783 = vmatmul.bf16.gmra.mxu0 %v643_v61  ;;  %v1220_v8 = vmax.f32 %v1188_v6, 0.0  ;;  %1160 = vmatmul.bf16.gmra.mxu3 %v3486_v62  ;;  %v4426_v6 = vld [vmem:[%s4834_s13 + $0xf4] sm:$0xf0] }
 0x12a   : > { %984 = vmatmul.bf16.gmra.mxu1 %v3486_v62  ;;  %v1269_v19 = vadd.f32 %v4934_v30, %v946_v5  ;;  %v3493_v5 = vld [vmem:[%s4834_s13 + $0xf0] sm:$0xf] }
 0x12b   : > { %1073 = vmatmul.bf16.gmra.mxu2 %v643_v61  ;;  %v5018_v11 = vpack.c.bf16 %v1220_v8, %v1219_v7  ;;  %v3494_v14 = vor.u32 %v4426_v6, %v3493_v5 }
 0x12c   : > { %v1121_v13 = vpop.f32.mrf.mxu3  ;;  %v1301_v29 = vmax.f32 %v1269_v19, 0.0 }
 0x12d   : > { %v1122_v25 = vadd.f32 %v1121_v13, %v1029_v38  ;;  %v645_v13 = vpack.c.b16 %v629_v3, %v628_v2 }
 0x12e   : > { %v1034_v12 = vpop.f32.mrf.mxu2  ;;  %v746_v17 = vpop.f32.mrf.mxu0 }
 0x12f   : > { %v947_v18 = vpop.f32.mrf.mxu1  ;;  %v1189_v41 = vadd.f32 %v4934_v30, %v1122_v25 }
 0x130   : > { %v948_v20 = vadd.f32 %v947_v18, %v746_v17 }
 0x131   : > { %v1221_v46 = vmax.f32 %v1189_v41, 0.0 }
 0x132   : > { %v1270_v21 = vadd.f32 %v4934_v30, %v948_v20 }
 0x134   : > { %v1302_v31 = vmax.f32 %v1270_v21, 0.0  ;;  %v1123_v35 = vpop.f32.mrf.mxu3 }
 0x135   : > { %v1124_v38 = vadd.f32 %v1123_v35, %v1031_v59 }
 0x136   : > { %v1036_v34 = vpop.f32.mrf.mxu2  ;;  %v5027_v40 = vpack.c.bf16 %v1302_v31, %v1301_v29  ;;  %v749_v42 = vpop.f32.mrf.mxu0 }
 0x137   : > { %v950_v43 = vpop.f32.mrf.mxu1  ;;  %v1190_v45 = vadd.f32 %v4934_v30, %v1124_v38  ;;  %v1211_v38 = vmax.f32 %v1179_v33, 0.0 }
 0x138   : > { %v951_v44 = vadd.f32 %v950_v43, %v749_v42 }
 0x139   : > { %788 = vmatmul.bf16.gmra.mxu0 %v644_v36  ;;  %v1222_v47 = vmax.f32 %v1190_v45, 0.0  ;;  %1165 = vmatmul.bf16.gmra.mxu3 %v3490_v39 }
 0x13a   : > { %989 = vmatmul.bf16.gmra.mxu1 %v3490_v39  ;;  %v1271_v61 = vadd.f32 %v4934_v30, %v951_v44 }
 0x13b   : > { %1078 = vmatmul.bf16.gmra.mxu2 %v644_v36  ;;  %v5036_v54 = vpack.c.bf16 %v1222_v47, %v1221_v46 }
 0x13c   : > { %v1126_v56 = vpop.f32.mrf.mxu3  ;;  %v1303_v7 = vmax.f32 %v1271_v61, 0.0 }
 0x13d   : > { %v1127_v4 = vadd.f32 %v1126_v56, %v1034_v12 }
 0x13e   : > { %v1039_v55 = vpop.f32.mrf.mxu2  ;;  %v751_v59 = vpop.f32.mrf.mxu0 }
 0x13f   : > { %v952_v60 = vpop.f32.mrf.mxu1  ;;  %v1191_v17 = vadd.f32 %v4934_v30, %v1127_v4 }
 0x140   : > { %v953_v62 = vadd.f32 %v952_v60, %v751_v59  ;;  %v4481_v59 = vld [vmem:[%s5681_s6 + $0x70] sm:$0xff] }
 0x141   : > { %v1223_v12 = vmax.f32 %v1191_v17, 0.0  ;;  %2018 = vmatpush.bf16.msrb.mxu3 %v4481_v59 }
 0x142   : > { %v1272_v1 = vadd.f32 %v4934_v30, %v953_v62 }
 0x144   : > { %v1304_v8 = vmax.f32 %v1272_v1, 0.0  ;;  %v1128_v10 = vpop.f32.mrf.mxu3 }
 0x145   : > { %v1129_v18 = vadd.f32 %v1128_v10, %v1036_v34  ;;  %v1180_v34 = vadd.f32 %v4934_v30, %v4950_v50 }
 0x146   : > { %v1041_v9 = vpop.f32.mrf.mxu2  ;;  %v5042_v16 = vpack.c.bf16 %v1304_v8, %v1303_v7  ;;  %v754_v19 = vpop.f32.mrf.mxu0 }
 0x147   : > { %v955_v20 = vpop.f32.mrf.mxu1  ;;  %v1192_v22 = vadd.f32 %v4934_v30, %v1129_v18  ;;  %v1212_v42 = vmax.f32 %v1180_v34, 0.0 }
 0x148   : > { %v956_v21 = vadd.f32 %v955_v20, %v754_v19 }
 0x149   : > { %793 = vmatmul.bf16.gmra.mxu0 %v645_v13  ;;  %v1224_v24 = vmax.f32 %v1192_v22, 0.0  ;;  %1170 = vmatmul.bf16.gmra.mxu3 %v3494_v14  ;;  %v1243_v50 = vpack.c.bf16 %v1212_v42, %v1211_v38 }
 0x14a   : > { %994 = vmatmul.bf16.gmra.mxu1 %v3494_v14  ;;  %v1273_v35 = vadd.f32 %v4934_v30, %v956_v21 }
 0x14b   : > { %1083 = vmatmul.bf16.gmra.mxu2 %v645_v13  ;;  %v5046_v25 = vpack.c.bf16 %v1224_v24, %v1223_v12 }
 0x14c   : > { %v1131_v28 = vpop.f32.mrf.mxu3  ;;  %v1305_v43 = vmax.f32 %v1273_v35, 0.0 }
 0x14d   : > { %v1132_v41 = vadd.f32 %v1131_v28, %v1039_v55 }
 0x14e   : > { %v1044_v27 = vpop.f32.mrf.mxu2  ;;  %v756_v29 = vpop.f32.mrf.mxu0 }
 0x14f   : > { %v957_v31 = vpop.f32.mrf.mxu1  ;;  %v1193_v49 = vadd.f32 %v4934_v30, %v1132_v41 }
 0x150   : > { %v958_v36 = vadd.f32 %v957_v31, %v756_v29 }
 0x151   : > { %v1225_v55 = vmax.f32 %v1193_v49, 0.0 }
 0x152   : > { %v1274_v39 = vadd.f32 %v4934_v30, %v958_v36 }
 0x154   : > { %v1306_v44 = vmax.f32 %v1274_v39, 0.0  ;;  %v1133_v46 = vpop.f32.mrf.mxu3 }
 0x155   : > { %v1134_v32 = vadd.f32 %v1133_v46, %v1041_v9 }
 0x156   : > { %v1046_v45 = vpop.f32.mrf.mxu2  ;;  %v5054_v47 = vpack.c.bf16 %v1306_v44, %v1305_v43  ;;  %v759_v51 = vpop.f32.mrf.mxu0 }
 0x157   : > { %v960_v52 = vpop.f32.mrf.mxu1  ;;  %v1194_v57 = vadd.f32 %v4934_v30, %v1134_v32 }
 0x158   : > { %v961_v56 = vadd.f32 %v960_v52, %v759_v51  ;;  %v4480_v51 = vld [vmem:[%s5681_s6 + $0x68] sm:$0xff] }
 0x159   : > { %1445 = vmatmul.bf16.vlgmr.msrb.gmra.mxu0 %v4948_v48  ;;  %v1226_v58 = vmax.f32 %v1194_v57, 0.0  ;;  %2019 = vmatpush.bf16.msrb.mxu3 %v4480_v51 }
 0x15a   : > { %1582 = vmatmul.bf16.vlgmr.msrb.gmra.mxu1 %v1243_v50  ;;  %v1275_v3 = vadd.f32 %v4934_v30, %v961_v56 }
 0x15b   : > { %1719 = vmatmul.bf16.vlgmr.msrb.gmra.mxu2 %v4948_v48  ;;  %v5063_v60 = vpack.c.bf16 %v1226_v58, %v1225_v55 }
 0x15c   : > { %v1136_v62 = vpop.f32.mrf.mxu3  ;;  %v1307_v7 = vmax.f32 %v1275_v3, 0.0 }
 0x15d   : > { %v1137_v6 = vadd.f32 %v1136_v62, %v1044_v27 }
 0x15e   : > { %v1049_v61 = vpop.f32.mrf.mxu2  ;;  %v761_v1 = vpop.f32.mrf.mxu0 }
 0x15f   : > { %v962_v2 = vpop.f32.mrf.mxu1  ;;  %v1195_v13 = vadd.f32 %v4934_v30, %v1137_v6 }
 0x160   : > { %v963_v4 = vadd.f32 %v962_v2, %v761_v1 }
 0x161   : > { %v1227_v21 = vmax.f32 %v1195_v13, 0.0 }
 0x162   : > { %v1276_v5 = vadd.f32 %v4934_v30, %v963_v4 }
 0x164   : > { %v1308_v8 = vmax.f32 %v1276_v5, 0.0  ;;  %v1138_v9 = vpop.f32.mrf.mxu3 }
 0x165   : > { %v1139_v14 = vadd.f32 %v1138_v9, %v1046_v45 }
 0x166   : > { %v1051_v48 = vpop.f32.mrf.mxu2  ;;  %v5067_v10 = vpack.c.bf16 %v1308_v8, %v1307_v7  ;;  %v764_v17 = vpop.f32.mrf.mxu0 }
 0x167   : > { %v965_v18 = vpop.f32.mrf.mxu1  ;;  %v1196_v20 = vadd.f32 %v4934_v30, %v1139_v14 }
 0x168   : > { %v966_v19 = vadd.f32 %v965_v18, %v764_v17 }
 0x169   : > { %1450 = vmatmul.bf16.gmra.mxu0 %v4961_v15  ;;  %v1228_v22 = vmax.f32 %v1196_v20, 0.0 }
 0x16a   : > { %1587 = vmatmul.bf16.gmra.mxu1 %v4967_v26  ;;  %v1277_v31 = vadd.f32 %v4934_v30, %v966_v19 }
 0x16b   : > { %1724 = vmatmul.bf16.gmra.mxu2 %v4961_v15  ;;  %v5074_v12 = vpack.c.bf16 %v1228_v22, %v1227_v21 }
 0x16c   : > { %v1141_v27 = vpop.f32.mrf.mxu3  ;;  %v1309_v36 = vmax.f32 %v1277_v31, 0.0 }
 0x16d   : > { %v1142_v35 = vadd.f32 %v1141_v27, %v1049_v61 }
 0x16e   : > { %v1054_v24 = vpop.f32.mrf.mxu2  ;;  %v766_v28 = vpop.f32.mrf.mxu0 }
 0x16f   : > { %v967_v29 = vpop.f32.mrf.mxu1  ;;  %v1197_v15 = vadd.f32 %v4934_v30, %v1142_v35 }
 0x170   : > { %v968_v33 = vadd.f32 %v967_v29, %v766_v28 }
 0x171   : > { %v1229_v49 = vmax.f32 %v1197_v15, 0.0 }
 0x172   : > { %v1278_v34 = vadd.f32 %v4934_v30, %v968_v33 }
 0x174   : > { %v1310_v39 = vmax.f32 %v1278_v34, 0.0  ;;  %v1143_v26 = vpop.f32.mrf.mxu3 }
 0x175   : > { %v1144_v42 = vadd.f32 %v1143_v26, %v1051_v48 }
 0x176   : > { %v1056_v41 = vpop.f32.mrf.mxu2  ;;  %v5078_v38 = vpack.c.bf16 %v1310_v39, %v1309_v36  ;;  %v769_v43 = vpop.f32.mrf.mxu0 }
 0x177   : > { %v970_v44 = vpop.f32.mrf.mxu1  ;;  %v1198_v46 = vadd.f32 %v4934_v30, %v1144_v42  ;;  %v4479_v42 = vld [vmem:[%s5681_s6 + $0x60] sm:$0xff] }
 0x178   : > { %v971_v45 = vadd.f32 %v970_v44, %v769_v43  ;;  %2020 = vmatpush.bf16.msrb.mxu3 %v4479_v42 }
 0x179   : > { %1455 = vmatmul.bf16.gmra.mxu0 %v4979_v53  ;;  %v1230_v32 = vmax.f32 %v1198_v46, 0.0 }
 0x17a   : > { %1592 = vmatmul.bf16.gmra.mxu1 %v4985_v0  ;;  %v1279_v58 = vadd.f32 %v4934_v30, %v971_v45 }
 0x17b   : > { %1729 = vmatmul.bf16.gmra.mxu2 %v4979_v53  ;;  %v5088_v52 = vpack.c.bf16 %v1230_v32, %v1229_v49 }
 0x17c   : > { %v1146_v56 = vpop.f32.mrf.mxu3  ;;  %v1311_v62 = vmax.f32 %v1279_v58, 0.0 }
 0x17d   : > { %v1147_v61 = vadd.f32 %v1146_v56, %v1054_v24 }
 0x17e   : > { %v1059_v50 = vpop.f32.mrf.mxu2  ;;  %v771_v57 = vpop.f32.mrf.mxu0 }
 0x17f   : > { %v972_v55 = vpop.f32.mrf.mxu1  ;;  %v1199_v4 = vadd.f32 %v4934_v30, %v1147_v61 }
 0x180   : > { %v973_v59 = vadd.f32 %v972_v55, %v771_v57 }
 0x181   : > { %v1231_v9 = vmax.f32 %v1199_v4, 0.0 }
 0x182   : > { %v1280_v0 = vadd.f32 %v4934_v30, %v973_v59 }
 0x184   : > { %v1312_v1 = vmax.f32 %v1280_v0, 0.0  ;;  %v1148_v2 = vpop.f32.mrf.mxu3 }
 0x185   : > { %v1149_v5 = vadd.f32 %v1148_v2, %v1056_v41 }
 0x186   : > { %v1061_v53 = vpop.f32.mrf.mxu2  ;;  %v5092_v3 = vpack.c.bf16 %v1312_v1, %v1311_v62  ;;  %v774_v6 = vpop.f32.mrf.mxu0 }
 0x187   : > { %v975_v7 = vpop.f32.mrf.mxu1  ;;  %v1200_v48 = vadd.f32 %v4934_v30, %v1149_v5 }
 0x188   : > { %v976_v8 = vadd.f32 %v975_v7, %v774_v6 }
 0x189   : > { %1460 = vmatmul.bf16.gmra.mxu0 %v4994_v23  ;;  %v1232_v13 = vmax.f32 %v1200_v48, 0.0 }
 0x18a   : > { %1597 = vmatmul.bf16.gmra.mxu1 %v5000_v37  ;;  %v1281_v21 = vadd.f32 %v4934_v30, %v976_v8 }
 0x18b   : > { %1734 = vmatmul.bf16.gmra.mxu2 %v4994_v23  ;;  %v5099_v14 = vpack.c.bf16 %v1232_v13, %v1231_v9 }
 0x18c   : > { %v1151_v18 = vpop.f32.mrf.mxu3  ;;  %v1313_v28 = vmax.f32 %v1281_v21, 0.0 }
 0x18d   : > { %v1152_v27 = vadd.f32 %v1151_v18, %v1059_v50 }
 0x18e   : > { %v1064_v17 = vpop.f32.mrf.mxu2  ;;  %v776_v19 = vpop.f32.mrf.mxu0 }
 0x18f   : > { %v977_v20 = vpop.f32.mrf.mxu1  ;;  %v1201_v23 = vadd.f32 %v4934_v30, %v1152_v27 }
 0x190   : > { %v978_v22 = vadd.f32 %v977_v20, %v776_v19 }
 0x191   : > { %v1233_v26 = vmax.f32 %v1201_v23, 0.0 }
 0x192   : > { %v1282_v24 = vadd.f32 %v4934_v30, %v978_v22 }
 0x194   : > { %v1314_v29 = vmax.f32 %v1282_v24, 0.0  ;;  %v1153_v37 = vpop.f32.mrf.mxu3 }
 0x195   : > { %v1154_v34 = vadd.f32 %v1153_v37, %v1061_v53 }
 0x196   : > { %v1066_v31 = vpop.f32.mrf.mxu2  ;;  %v5103_v33 = vpack.c.bf16 %v1314_v29, %v1313_v28  ;;  %v779_v35 = vpop.f32.mrf.mxu0 }
 0x197   : > { %v980_v36 = vpop.f32.mrf.mxu1  ;;  %v1202_v41 = vadd.f32 %v4934_v30, %v1154_v34 }
 0x198   : > { %v981_v39 = vadd.f32 %v980_v36, %v779_v35  ;;  %v4554_v36 = vld [vmem:[%s5681_s6 + $0x2b8] sm:$0xff] }
 0x199   : > { %1465 = vmatmul.bf16.gmra.mxu0 %v5012_v63  ;;  %v1234_v15 = vmax.f32 %v1202_v41, 0.0  ;;  %2866 = vmatpush.bf16.msra.mxu2 %v4554_v36 }
 0x19a   : > { %1602 = vmatmul.bf16.gmra.mxu1 %v5018_v11  ;;  %v1283_v32 = vadd.f32 %v4934_v30, %v981_v39  ;;  %v4476_v39 = vld [vmem:[%s5681_s6 + $0x48] sm:$0xff] }
 0x19b   : > { %1739 = vmatmul.bf16.gmra.mxu2 %v5012_v63  ;;  %v5113_v43 = vpack.c.bf16 %v1234_v15, %v1233_v26 }
 0x19c   : > { %v1156_v45 = vpop.f32.mrf.mxu3  ;;  %v1315_v56 = vmax.f32 %v1283_v32, 0.0  ;;  %v4474_v32 = vld [vmem:[%s5681_s6 + $0x38] sm:$0xff] }
 0x19d   : > { %v1157_v50 = vadd.f32 %v1156_v45, %v1064_v17 }
 0x19e   : > { %v1069_v44 = vpop.f32.mrf.mxu2  ;;  %v781_v46 = vpop.f32.mrf.mxu0 }
 0x19f   : > { %v982_v49 = vpop.f32.mrf.mxu1  ;;  %v1203_v59 = vadd.f32 %v4934_v30, %v1157_v50 }
 0x1a0   : > { %v983_v51 = vadd.f32 %v982_v49, %v781_v46  ;;  %v4538_v46 = vld [vmem:[%s5681_s6 + $0x238] sm:$0xff] }
 0x1a1   : > { %v1235_v2 = vmax.f32 %v1203_v59, 0.0  ;;  %v4546_v49 = vld [vmem:[%s5681_s6 + $0x278] sm:$0xff]  ;;  %2692 = vmatpush.bf16.msra.mxu0 %v4538_v46 }
 0x1a2   : > { %v1284_v11 = vadd.f32 %v4934_v30, %v983_v51  ;;  %2779 = vmatpush.bf16.msra.mxu1 %v4546_v49 }
 0x1a4   : > { %v1316_v57 = vmax.f32 %v1284_v11, 0.0  ;;  %v1158_v55 = vpop.f32.mrf.mxu3 }
 0x1a5   : > { %v1159_v0 = vadd.f32 %v1158_v55, %v1066_v31  ;;  %v4477_v31 = vld [vmem:[%s5681_s6 + $0x50] sm:$0xff] }
 0x1a6   : > { %v1071_v63 = vpop.f32.mrf.mxu2  ;;  %v5117_v58 = vpack.c.bf16 %v1316_v57, %v1315_v56  ;;  %v784_v61 = vpop.f32.mrf.mxu0  ;;  %v4473_v57 = vld [vmem:[%s5681_s6 + $0x30] sm:$0xff] }
 0x1a7   : > { %v985_v62 = vpop.f32.mrf.mxu1  ;;  %v1204_v53 = vadd.f32 %v4934_v30, %v1159_v0 }
 0x1a8   : > { %v986_v1 = vadd.f32 %v985_v62, %v784_v61 }
 0x1a9   : > { %1470 = vmatmul.bf16.gmra.mxu0 %v5027_v40  ;;  %v1236_v4 = vmax.f32 %v1204_v53, 0.0 }
 0x1aa   : > { %1607 = vmatmul.bf16.gmra.mxu1 %v5036_v54  ;;  %v1285_v9 = vadd.f32 %v4934_v30, %v986_v1  ;;  %v4478_v54 = vld [vmem:[%s5681_s6 + $0x58] sm:$0xff] }
 0x1ab   : > { %1744 = vmatmul.bf16.gmra.mxu2 %v5027_v40  ;;  %v5124_v5 = vpack.c.bf16 %v1236_v4, %v1235_v2  ;;  %2021 = vmatpush.bf16.msrb.mxu3 %v4478_v54  ;;  %v4472_v2 = vld [vmem:[%s5681_s6 + $0x28] sm:$0xff] }
 0x1ac   : > { %v1161_v7 = vpop.f32.mrf.mxu3  ;;  %v1317_v19 = vmax.f32 %v1285_v9, 0.0 }
 0x1ad   : > { %v1162_v18 = vadd.f32 %v1161_v7, %v1069_v44 }
 0x1ae   : > { %v1074_v6 = vpop.f32.mrf.mxu2  ;;  %v786_v8 = vpop.f32.mrf.mxu0 }
 0x1af   : > { %v987_v48 = vpop.f32.mrf.mxu1  ;;  %v1205_v24 = vadd.f32 %v4934_v30, %v1162_v18  ;;  %2022 = vmatpush.bf16.msrb.mxu3 %v4477_v31  ;;  %v4622_v31 = vld [vmem:[%s5678_s3] ss:$0 sm:$0xff] }
 0x1b0   : > { %v988_v13 = vadd.f32 %v987_v48, %v786_v8  ;;  %v4471_v8 = vld [vmem:[%s5681_s6 + $0x20] sm:$0xff] }
 0x1b1   : > { %v1237_v34 = vmax.f32 %v1205_v24, 0.0  ;;  %v4469_v24 = vld [vmem:[%s5681_s6 + $0x10] sm:$0xff] }
 0x1b2   : > { %v1286_v17 = vadd.f32 %v4934_v30, %v988_v13 }
 0x1b3   : > { %2023 = vmatpush.bf16.msrb.mxu3 %v4476_v39  ;;  %v4553_v39 = vld [vmem:[%s5681_s6 + $0x2b0] sm:$0xff] }
 0x1b4   : > { %v1318_v20 = vmax.f32 %v1286_v17, 0.0  ;;  %v1163_v21 = vpop.f32.mrf.mxu3  ;;  %2867 = vmatpush.bf16.msra.mxu2 %v4553_v39  ;;  %v4487_v39 = vld [vmem:[%s5681_s6 + $0xa0] sm:$0xff] }
 0x1b5   : > { %v1164_v27 = vadd.f32 %v1163_v21, %v1071_v63 }
 0x1b6   : > { %v1076_v40 = vpop.f32.mrf.mxu2  ;;  %v5131_v22 = vpack.c.bf16 %v1318_v20, %v1317_v19  ;;  %v789_v28 = vpop.f32.mrf.mxu0 }
 0x1b7   : > { %v990_v29 = vpop.f32.mrf.mxu1  ;;  %v1206_v23 = vadd.f32 %v4934_v30, %v1164_v27 }
 0x1b8   : > { %v991_v37 = vadd.f32 %v990_v29, %v789_v28 }
 0x1b9   : > { %1475 = vmatmul.bf16.gmra.mxu0 %v5042_v16  ;;  %v1238_v35 = vmax.f32 %v1206_v23, 0.0 }
 0x1ba   : > { %1612 = vmatmul.bf16.gmra.mxu1 %v5046_v25  ;;  %v1287_v44 = vadd.f32 %v4934_v30, %v991_v37 }
 0x1bb   : > { %1749 = vmatmul.bf16.gmra.mxu2 %v5042_v16  ;;  %v5147_v41 = vpack.c.bf16 %v1238_v35, %v1237_v34  ;;  %v4475_v16 = vld [vmem:[%s5681_s6 + $0x40] sm:$0xff]  ;;  %v4468_v35 = vld [vmem:[%s5681_s6 + $0x8] sm:$0xff] }
 0x1bc   : > { %v1166_v15 = vpop.f32.mrf.mxu3  ;;  %2024 = vmatpush.bf16.msrb.mxu3 %v4475_v16  ;;  %v1319_v50 = vmax.f32 %v1287_v44, 0.0 }
 0x1bd   : > { %v1167_v11 = vadd.f32 %v1166_v15, %v1074_v6 }
 0x1be   : > { %v1079_v26 = vpop.f32.mrf.mxu2  ;;  %v791_v42 = vpop.f32.mrf.mxu0 }
 0x1bf   : > { %v992_v25 = vpop.f32.mrf.mxu1  ;;  %v1207_v0 = vadd.f32 %v4934_v30, %v1167_v11 }
 0x1c0   : > { %v993_v45 = vadd.f32 %v992_v25, %v791_v42  ;;  %2085 = vmatpush.bf16.msra.mxu3 %v4474_v32  ;;  %v4467_v42 = vld [vmem:[%s5681_s6] sm:$0xff] }
 0x1c1   : > { %v1239_v6 = vmax.f32 %v1207_v0, 0.0 }
 0x1c2   : > { %v1288_v51 = vadd.f32 %v4934_v30, %v993_v45 }
 0x1c4   : > { %v1320_v56 = vmax.f32 %v1288_v51, 0.0  ;;  %v1168_v55 = vpop.f32.mrf.mxu3  ;;  %2086 = vmatpush.bf16.msra.mxu3 %v4473_v57 }
 0x1c5   : > { %v1169_v61 = vadd.f32 %v1168_v55, %v1076_v40 }
 0x1c6   : > { %v1081_v63 = vpop.f32.mrf.mxu2  ;;  %v5166_v59 = vpack.c.bf16 %v1320_v56, %v1319_v50  ;;  %v794_v62 = vpop.f32.mrf.mxu0  ;;  %v5220_v50 = vld [vmem:[%s5680_s5] ss:$0 sm:$0xff] }
 0x1c7   : > { %v995_v1 = vpop.f32.mrf.mxu1  ;;  %v1208_v4 = vadd.f32 %v4934_v30, %v1169_v61 }
 0x1c8   : > { %v996_v53 = vadd.f32 %v995_v1, %v794_v62  ;;  %2087 = vmatpush.bf16.msra.mxu3 %v4472_v2 }
 0x1c9   : > { %1480 = vmatmul.bf16.gmra.mxu0 %v5054_v47  ;;  %v1240_v7 = vmax.f32 %v1208_v4, 0.0 }
 0x1ca   : > { %1617 = vmatmul.bf16.gmra.mxu1 %v5063_v60  ;;  %v1289_v54 = vadd.f32 %v4934_v30, %v996_v53  ;;  %v4470_v60 = vld [vmem:[%s5681_s6 + $0x18] sm:$0xff] }
 0x1cb   : > { %1754 = vmatmul.bf16.gmra.mxu2 %v5054_v47  ;;  %v5179_v48 = vpack.c.bf16 %v1240_v7, %v1239_v6 }
 0x1cc   : > { %v1171_v13 = vpop.f32.mrf.mxu3  ;;  %2088 = vmatpush.bf16.msra.mxu3 %v4471_v8  ;;  %v1321_v40 = vmax.f32 %v1289_v54, 0.0 }
 0x1cd   : > { %v1172_v20 = vadd.f32 %v1171_v13, %v1079_v26 }
 0x1ce   : > { %v1084_v9 = vpop.f32.mrf.mxu2  ;;  %v796_v17 = vpop.f32.mrf.mxu0 }
 0x1cf   : > { %v997_v18 = vpop.f32.mrf.mxu1  ;;  %v1209_v37 = vadd.f32 %v4622_v31, %v1172_v20  ;;  %v4489_v20 = vld [vmem:[%s5681_s6 + $0xb0] sm:$0xff] }
 0x1d0   : > { %v998_v19 = vadd.f32 %v997_v18, %v796_v17  ;;  %2089 = vmatpush.bf16.msra.mxu3 %v4470_v60  ;;  %v4490_v17 = vld [vmem:[%s5681_s6 + $0xb8] sm:$0xff] }
 0x1d1   : > { %v1241_v26 = vmax.f32 %v1209_v37, 0.0 }
 0x1d2   : > { %v1290_v47 = vadd.f32 %v4934_v30, %v998_v19  ;;  %v4552_v19 = vld [vmem:[%s5681_s6 + $0x2a8] sm:$0xff] }
 0x1d3   : > { %2868 = vmatpush.bf16.msra.mxu2 %v4552_v19 }
 0x1d4   : > { %v1322_v21 = vmax.f32 %v1290_v47, 0.0  ;;  %v1173_v28 = vpop.f32.mrf.mxu3  ;;  %2090 = vmatpush.bf16.msra.mxu3 %v4469_v24  ;;  %v4536_v24 = vld [vmem:[%s5681_s6 + $0x228] sm:$0xff] }
 0x1d5   : > { %v1174_v23 = vadd.f32 %v1173_v28, %v1081_v63  ;;  %v4488_v28 = vld [vmem:[%s5681_s6 + $0xa8] sm:$0xff] }
 0x1d6   : > { %v1085_v27 = vpop.f32.mrf.mxu2  ;;  %v5189_v29 = vpack.c.bf16 %v1322_v21, %v1321_v40  ;;  %v1446_v34 = vpop.f32.mrf.mxu0 }
 0x1d7   : > { %v1583_v30 = vpop.f32.mrf.mxu1  ;;  %v1210_v36 = vadd.f32 %v4622_v31, %v1174_v23  ;;  %v4544_v27 = vld [vmem:[%s5681_s6 + $0x268] sm:$0xff] }
 0x1d8   : > { %2091 = vmatpush.bf16.msra.mxu3 %v4468_v35  ;;  %v1584_v8 = vadd.f32 %v1583_v30, %v1446_v34 }
 0x1d9   : > { %1485 = vmatmul.bf16.gmra.mxu0 %v5067_v10  ;;  %v1242_v15 = vmax.f32 %v1210_v36, 0.0 }
 0x1da   : > { %1622 = vmatmul.bf16.gmra.mxu1 %v5074_v12  ;;  %v4537_v12 = vld [vmem:[%s5681_s6 + $0x230] sm:$0xff]  ;;  %v1834_v60 = vadd.f32 %v5220_v50, %v1584_v8  ;;  %v4535_v8 = vld [vmem:[%s5681_s6 + $0x220] sm:$0xff] }
 0x1db   : > { %1759 = vmatmul.bf16.gmra.mxu2 %v5067_v10  ;;  %v5206_v25 = vpack.c.bf16 %v1242_v15, %v1241_v26  ;;  %v4545_v10 = vld [vmem:[%s5681_s6 + $0x270] sm:$0xff]  ;;  %2693 = vmatpush.bf16.msra.mxu0 %v4537_v12 }
 0x1dc   : > { %2092 = vmatpush.bf16.msra.mxu3 %v4467_v42  ;;  %2780 = vmatpush.bf16.msra.mxu1 %v4545_v10  ;;  %v1866_v21 = vmax.f32 %v1834_v60, 0.0 }
 0x1de   : > { %v1720_v16 = vpop.f32.mrf.mxu2  ;;  %v1448_v44 = vpop.f32.mrf.mxu0  ;;  %v1898_v23 = vpack.c.bf16 %v1866_v21, %v1866_v21 }
 0x1df   : > { %v1585_v45 = vpop.f32.mrf.mxu1  ;;  %2694 = vmatpush.bf16.msra.mxu0 %v4536_v24 }
 0x1e0   : > { %v1586_v6 = vadd.f32 %v1585_v45, %v1448_v44  ;;  %2781 = vmatpush.bf16.msra.mxu1 %v4544_v27  ;;  %v2033_v42 = vunpack.c.l.b16 %v1898_v23  ;;  %v4486_v44 = vld [vmem:[%s5681_s6 + $0x98] sm:$0xff] }
 0x1e2   : > { %v1835_v18 = vadd.f32 %v5220_v50, %v1586_v6 }
 0x1e3   : > { %2695 = vmatpush.bf16.msra.mxu0 %v4535_v8 }
 0x1e4   : > { %v1867_v40 = vmax.f32 %v1835_v18, 0.0 }
 0x1e6   : > { %v1722_v46 = vpop.f32.mrf.mxu2  ;;  %v1451_v49 = vpop.f32.mrf.mxu0  ;;  %v1899_v31 = vpack.c.bf16 %v1867_v40, %v1867_v40 }
 0x1e7   : > { %v1588_v32 = vpop.f32.mrf.mxu1 }
 0x1e8   : > { %v1589_v51 = vadd.f32 %v1588_v32, %v1451_v49  ;;  %v2034_v26 = vunpack.c.l.b16 %v1899_v31 }
 0x1e9   : > { %1490 = vmatmul.bf16.gmra.mxu0 %v5078_v38 }
 0x1ea   : > { %v1800_v11 = vadd.f32 %v1720_v16, %v1589_v51  ;;  %1627 = vmatmul.bf16.gmra.mxu1 %v5088_v52  ;;  %v2035_v45 = vpack.c.b16 %v2034_v26, %v2033_v42 }
 0x1eb   : > { %1764 = vmatmul.bf16.gmra.mxu2 %v5078_v38 }
 0x1ec   : > { %v1836_v56 = vadd.f32 %v5220_v50, %v1800_v11  ;;  %v4484_v11 = vld [vmem:[%s5681_s6 + $0x88] sm:$0xff] }
 0x1ee   : > { %v1725_v57 = vpop.f32.mrf.mxu2  ;;  %v1453_v63 = vpop.f32.mrf.mxu0  ;;  %v1868_v61 = vmax.f32 %v1836_v56, 0.0 }
 0x1ef   : > { %v1590_v55 = vpop.f32.mrf.mxu1 }
 0x1f0   : > { %v1591_v0 = vadd.f32 %v1590_v55, %v1453_v63  ;;  %v1900_v53 = vpack.c.bf16 %v1868_v61, %v1868_v61  ;;  %v4483_v61 = vld [vmem:[%s5681_s6 + $0x80] sm:$0xff] }
 0x1f2   : > { %v1801_v62 = vadd.f32 %v1722_v46, %v1591_v0  ;;  %v1965_v9 = vunpack.c.l.b16 %v1900_v53 }
 0x1f4   : > { %v1837_v1 = vadd.f32 %v5220_v50, %v1801_v62 }
 0x1f6   : > { %v1869_v2 = vmax.f32 %v1837_v1, 0.0  ;;  %v1727_v52 = vpop.f32.mrf.mxu2  ;;  %v1456_v4 = vpop.f32.mrf.mxu0  ;;  %v4498_v1 = vld [vmem:[%s5681_s6 + $0xf8] sm:$0xff] }
 0x1f7   : > { %v1593_v38 = vpop.f32.mrf.mxu1 }
 0x1f8   : > { %v1901_v7 = vpack.c.bf16 %v1869_v2, %v1869_v2  ;;  %v1594_v34 = vadd.f32 %v1593_v38, %v1456_v4  ;;  %v4551_v4 = vld [vmem:[%s5681_s6 + $0x2a0] sm:$0xff] }
 0x1f9   : > { %1495 = vmatmul.bf16.gmra.mxu0 %v5092_v3  ;;  %2869 = vmatpush.bf16.msra.mxu2 %v4551_v4 }
 0x1fa   : > { %v1966_v13 = vunpack.c.l.b16 %v1901_v7  ;;  %1632 = vmatmul.bf16.gmra.mxu1 %v5099_v14  ;;  %v1802_v16 = vadd.f32 %v1725_v57, %v1594_v34 }
 0x1fb   : > { %1769 = vmatmul.bf16.gmra.mxu2 %v5092_v3 }
 0x1fc   : > { %v1967_v54 = vpack.c.b16 %v1966_v13, %v1965_v9  ;;  %v1838_v10 = vadd.f32 %v5220_v50, %v1802_v16  ;;  %v4543_v9 = vld [vmem:[%s5681_s6 + $0x260] sm:$0xff]  ;;  %v4505_v16 = vld [vmem:[%s5681_s6 + $0x130] sm:$0xff] }
 0x1fd   : > { %2782 = vmatpush.bf16.msra.mxu1 %v4543_v9  ;;  %v4501_v9 = vld [vmem:[%s5681_s6 + $0x110] sm:$0xff] }
 0x1fe   : > { %v5235_v47 = vpop.f32.mrf.mxu2  ;;  %2025 = vmatmul.bf16.vlgmr.msrb.gmra.mxu3 %v1967_v54  ;;  %v1458_v14 = vpop.f32.mrf.mxu0  ;;  %v1870_v51 = vmax.f32 %v1838_v10, 0.0 }
 0x1ff   : > { %2170 = vmatpush.bf16.msrb.mxu3 %v4490_v17  ;;  %v1595_v3 = vpop.f32.mrf.mxu1  ;;  %v4495_v17 = vld [vmem:[%s5681_s6 + $0xe0] sm:$0xff] }
 0x200   : > { %v1596_v37 = vadd.f32 %v1595_v3, %v1458_v14  ;;  %v1902_v57 = vpack.c.bf16 %v1870_v51, %v1870_v51  ;;  %v4494_v3 = vld [vmem:[%s5681_s6 + $0xd8] sm:$0xff] }
 0x202   : > { %v1803_v15 = vadd.f32 %v1727_v52, %v1596_v37  ;;  %v2118_v53 = vunpack.c.l.b16 %v1902_v57  ;;  %v4497_v52 = vld [vmem:[%s5681_s6 + $0xf0] sm:$0xff] }
 0x203   : > { %2171 = vmatpush.bf16.msrb.mxu3 %v4489_v20 }
 0x204   : > { %v1839_v12 = vadd.f32 %v5220_v50, %v1803_v15 }
 0x206   : > { %v1732_v30 = vpop.f32.mrf.mxu2  ;;  %v1461_v35 = vpop.f32.mrf.mxu0 }
 0x207   : > { %2172 = vmatpush.bf16.msrb.mxu3 %v4488_v28  ;;  %v1598_v36 = vpop.f32.mrf.mxu1 }
 0x208   : > { %v1599_v13 = vadd.f32 %v1598_v36, %v1461_v35 }
 0x209   : > { %1500 = vmatmul.bf16.gmra.mxu0 %v5103_v33 }
 0x20a   : > { %1637 = vmatmul.bf16.gmra.mxu1 %v5113_v43  ;;  %v1871_v43 = vmax.f32 %v1839_v12, 0.0  ;;  %v1804_v19 = vadd.f32 %v5235_v47, %v1599_v13  ;;  %v4493_v47 = vld [vmem:[%s5681_s6 + $0xd0] sm:$0xff]  ;;  %v4504_v12 = vld [vmem:[%s5681_s6 + $0x128] sm:$0xff] }
 0x20b   : > { %1774 = vmatmul.bf16.gmra.mxu2 %v5103_v33  ;;  %2173 = vmatpush.bf16.msrb.mxu3 %v4487_v39  ;;  %v4485_v33 = vld [vmem:[%s5681_s6 + $0x90] sm:$0xff] }
 0x20c   : > { %v1903_v56 = vpack.c.bf16 %v1871_v43, %v1871_v43  ;;  %v1840_v40 = vadd.f32 %v5220_v50, %v1804_v19 }
 0x20e   : > { %v5260_v46 = vpop.f32.mrf.mxu2  ;;  %2093 = vmatmul.bf16.vlgmr.msra.gmra.mxu3 %v2035_v45  ;;  %v1463_v49 = vpop.f32.mrf.mxu0  ;;  %v2119_v62 = vunpack.c.l.b16 %v1903_v56  ;;  %v1872_v27 = vmax.f32 %v1840_v40, 0.0  ;;  %v4550_v45 = vld [vmem:[%s5681_s6 + $0x298] sm:$0xff] }
 0x20f   : > { %2174 = vmatpush.bf16.msrb.mxu3 %v4486_v44  ;;  %v1600_v32 = vpop.f32.mrf.mxu1  ;;  %2870 = vmatpush.bf16.msra.mxu2 %v4550_v45  ;;  %v4513_v45 = vld [vmem:[%s5681_s6 + $0x170] sm:$0xff] }
 0x210   : > { %v2120_v2 = vpack.c.b16 %v2119_v62, %v2118_v53  ;;  %v1904_v23 = vpack.c.bf16 %v1872_v27, %v1872_v27  ;;  %v4542_v62 = vld [vmem:[%s5681_s6 + $0x258] sm:$0xff] }
 0x211   : > { %2783 = vmatpush.bf16.msra.mxu1 %v4542_v62 }
 0x212   : > { %v2205_v36 = vunpack.c.l.b16 %v1904_v23 }
 0x213   : > { %2175 = vmatpush.bf16.msrb.mxu3 %v4485_v33 }
 0x216   : > { %v5268_v63 = vpop.f32.mrf.mxu2  ;;  %v5270_v55 = vpop.f32.mrf.mxu0 }
 0x217   : > { %2176 = vmatpush.bf16.msrb.mxu3 %v4484_v11  ;;  %v5272_v0 = vpop.f32.mrf.mxu1  ;;  %v4503_v11 = vld [vmem:[%s5681_s6 + $0x120] sm:$0xff] }
 0x218   : > { %v1604_v43 = vadd.f32 %v5272_v0, %v5270_v55 }
 0x219   : > { %1505 = vmatmul.bf16.gmra.mxu0 %v5117_v58 }
 0x21a   : > { %1642 = vmatmul.bf16.gmra.mxu1 %v5124_v5  ;;  %v1601_v5 = vadd.f32 %v1600_v32, %v1463_v49  ;;  %v1806_v55 = vadd.f32 %v5260_v46, %v1604_v43 }
 0x21b   : > { %1779 = vmatmul.bf16.gmra.mxu2 %v5117_v58  ;;  %2177 = vmatpush.bf16.msrb.mxu3 %v4483_v61  ;;  %v4496_v58 = vld [vmem:[%s5681_s6 + $0xe8] sm:$0xff] }
 0x21c   : > { %v1805_v18 = vadd.f32 %v1732_v30, %v1601_v5  ;;  %v4506_v30 = vld [vmem:[%s5681_s6 + $0x138] sm:$0xff] }
 0x21e   : > { %v5289_v38 = vpop.f32.mrf.mxu2  ;;  %2178 = vmatmul.bf16.vlgmr.msrb.gmra.mxu3 %v2120_v2  ;;  %v1468_v6 = vpop.f32.mrf.mxu0  ;;  %v1841_v20 = vadd.f32 %v5220_v50, %v1805_v18 }
 0x21f   : > { %2257 = vmatpush.bf16.msra.mxu3 %v4498_v1  ;;  %v1605_v7 = vpop.f32.mrf.mxu1  ;;  %v4533_v1 = vld [vmem:[%s5681_s6 + $0x210] sm:$0xff] }
 0x220   : > { %v1873_v21 = vmax.f32 %v1841_v20, 0.0  ;;  %v1606_v10 = vadd.f32 %v1605_v7, %v1468_v6  ;;  %v4532_v6 = vld [vmem:[%s5681_s6 + $0x208] sm:$0xff] }
 0x222   : > { %v1905_v37 = vpack.c.bf16 %v1873_v21, %v1873_v21  ;;  %v1807_v56 = vadd.f32 %v5268_v63, %v1606_v10  ;;  %v4502_v63 = vld [vmem:[%s5681_s6 + $0x118] sm:$0xff] }
 0x223   : > { %2258 = vmatpush.bf16.msra.mxu3 %v4497_v52 }
 0x224   : > { %v2206_v34 = vunpack.c.l.b16 %v1905_v37  ;;  %v1843_v53 = vadd.f32 %v5220_v50, %v1807_v56 }
 0x226   : > { %v5303_v54 = vpop.f32.mrf.mxu2  ;;  %v5306_v60 = vpop.f32.mrf.mxu0  ;;  %v2207_v42 = vpack.c.b16 %v2206_v34, %v2205_v36  ;;  %v1875_v13 = vmax.f32 %v1843_v53, 0.0  ;;  %v4541_v36 = vld [vmem:[%s5681_s6 + $0x250] sm:$0xff] }
 0x227   : > { %2259 = vmatpush.bf16.msra.mxu3 %v4496_v58  ;;  %v5308_v14 = vpop.f32.mrf.mxu1  ;;  %v1842_v58 = vadd.f32 %v5220_v50, %v1806_v55  ;;  %2784 = vmatpush.bf16.msra.mxu1 %v4541_v36  ;;  %v4522_v36 = vld [vmem:[%s5681_s6 + $0x1b8] sm:$0xff] }
 0x228   : > { %v1907_v21 = vpack.c.bf16 %v1875_v13, %v1875_v13  ;;  %v1609_v62 = vadd.f32 %v5308_v14, %v5306_v60  ;;  %v4510_v60 = vld [vmem:[%s5681_s6 + $0x158] sm:$0xff] }
 0x229   : > { %1510 = vmatmul.bf16.gmra.mxu0 %v5131_v22  ;;  %v1874_v20 = vmax.f32 %v1842_v58, 0.0 }
 0x22a   : > { %1647 = vmatmul.bf16.gmra.mxu1 %v5147_v41  ;;  %v4492_v41 = vld [vmem:[%s5681_s6 + $0xc8] sm:$0xff] }
 0x22b   : > { %2260 = vmatpush.bf16.msra.mxu3 %v4495_v17  ;;  %1784 = vmatmul.bf16.gmra.mxu2 %v5131_v22  ;;  %v4491_v22 = vld [vmem:[%s5681_s6 + $0xc0] sm:$0xff]  ;;  %v1906_v37 = vpack.c.bf16 %v1874_v20, %v1874_v20 }
 0x22e   : > { %v1745_v24 = vpop.f32.mrf.mxu2  ;;  %v5321_v28 = vpop.f32.mrf.mxu0 }
 0x22f   : > { %2261 = vmatpush.bf16.msra.mxu3 %v4494_v3  ;;  %v5323_v31 = vpop.f32.mrf.mxu1  ;;  %v4531_v3 = vld [vmem:[%s5681_s6 + $0x200] sm:$0xff] }
 0x230   : > { %v1611_v56 = vadd.f32 %v5323_v31, %v5321_v28 }
 0x232   : > { %v1809_v28 = vadd.f32 %v5303_v54, %v1611_v56 }
 0x233   : > { %2262 = vmatpush.bf16.msra.mxu3 %v4493_v47  ;;  %v4500_v47 = vld [vmem:[%s5681_s6 + $0x108] sm:$0xff] }
 0x234   : > { %v1845_v14 = vadd.f32 %v5220_v50, %v1809_v28 }
 0x236   : > { %v1747_v35 = vpop.f32.mrf.mxu2  ;;  %v1476_v39 = vpop.f32.mrf.mxu0 }
 0x237   : > { %2263 = vmatpush.bf16.msra.mxu3 %v4492_v41  ;;  %v1613_v26 = vpop.f32.mrf.mxu1 }
 0x238   : > { %v1614_v15 = vadd.f32 %v1613_v26, %v1476_v39  ;;  %v2292_v39 = vunpack.c.l.b16 %v1906_v37 }
 0x239   : > { %1515 = vmatmul.bf16.gmra.mxu0 %v5166_v59 }
 0x23a   : > { %v1810_v44 = vadd.f32 %v1745_v24, %v1614_v15  ;;  %1652 = vmatmul.bf16.gmra.mxu1 %v5179_v48  ;;  %v4534_v48 = vld [vmem:[%s5681_s6 + $0x218] sm:$0xff] }
 0x23b   : > { %2264 = vmatpush.bf16.msra.mxu3 %v4491_v22  ;;  %1789 = vmatmul.bf16.gmra.mxu2 %v5166_v59  ;;  %v2293_v22 = vunpack.c.l.b16 %v1907_v21  ;;  %v4508_v21 = vld [vmem:[%s5681_s6 + $0x148] sm:$0xff] }
 0x23c   : > { %v1846_v49 = vadd.f32 %v5220_v50, %v1810_v44  ;;  %2696 = vmatpush.bf16.msra.mxu0 %v4534_v48 }
 0x23d   : > { %v2294_v15 = vpack.c.b16 %v2293_v22, %v2292_v39  ;;  %v4570_v22 = vld [vmem:[%s5681_s6 + $0x338] sm:$0xff] }
 0x23e   : > { %2265 = vmatmul.bf16.vlgmr.msra.gmra.mxu3 %v2207_v42  ;;  %v1750_v32 = vpop.f32.mrf.mxu2  ;;  %v1478_v59 = vpop.f32.mrf.mxu0  ;;  %v1878_v57 = vmax.f32 %v1846_v49, 0.0 }
 0x23f   : > { %2344 = vmatpush.bf16.msrb.mxu3 %v4506_v30  ;;  %v1615_v33 = vpop.f32.mrf.mxu1 }
 0x240   : > { %v1616_v51 = vadd.f32 %v1615_v33, %v1478_v59  ;;  %2697 = vmatpush.bf16.msra.mxu0 %v4533_v1  ;;  %v1910_v2 = vpack.c.bf16 %v1878_v57, %v1878_v57 }
 0x242   : > { %v1811_v61 = vadd.f32 %v1747_v35, %v1616_v51  ;;  %v2466_v17 = vunpack.c.l.b16 %v1910_v2  ;;  %v4514_v35 = vld [vmem:[%s5681_s6 + $0x178] sm:$0xff]  ;;  %v4512_v51 = vld [vmem:[%s5681_s6 + $0x168] sm:$0xff]  ;;  %v1808_v2 = vadd.f32 %v5289_v38, %v1609_v62  ;;  %v4509_v38 = vld [vmem:[%s5681_s6 + $0x150] sm:$0xff] }
 0x243   : > { %2345 = vmatpush.bf16.msrb.mxu3 %v4505_v16 }
 0x244   : > { %v1847_v0 = vadd.f32 %v5220_v50, %v1811_v61  ;;  %2698 = vmatpush.bf16.msra.mxu0 %v4532_v6  ;;  %v4549_v61 = vld [vmem:[%s5681_s6 + $0x290] sm:$0xff] }
 0x245   : > { %2871 = vmatpush.bf16.msra.mxu2 %v4549_v61 }
 0x246   : > { %v1879_v52 = vmax.f32 %v1847_v0, 0.0  ;;  %v1752_v4 = vpop.f32.mrf.mxu2  ;;  %v1481_v7 = vpop.f32.mrf.mxu0  ;;  %v4511_v0 = vld [vmem:[%s5681_s6 + $0x160] sm:$0xff] }
 0x247   : > { %2346 = vmatpush.bf16.msrb.mxu3 %v4504_v12  ;;  %v1618_v46 = vpop.f32.mrf.mxu1  ;;  %v4540_v12 = vld [vmem:[%s5681_s6 + $0x248] sm:$0xff] }
 0x248   : > { %v1911_v5 = vpack.c.bf16 %v1879_v52, %v1879_v52  ;;  %v1619_v8 = vadd.f32 %v1618_v46, %v1481_v7  ;;  %2699 = vmatpush.bf16.msra.mxu0 %v4531_v3  ;;  %2785 = vmatpush.bf16.msra.mxu1 %v4540_v12  ;;  %v1844_v7 = vadd.f32 %v5220_v50, %v1808_v2 }
 0x249   : > { %1520 = vmatmul.bf16.gmra.mxu0 %v5189_v29 }
 0x24a   : > { %v2467_v18 = vunpack.c.l.b16 %v1911_v5  ;;  %v1812_v19 = vadd.f32 %v1750_v32, %v1619_v8  ;;  %1657 = vmatmul.bf16.gmra.mxu1 %v5206_v25  ;;  %v4548_v5 = vld [vmem:[%s5681_s6 + $0x288] sm:$0xff]  ;;  %v1877_v8 = vmax.f32 %v1845_v14, 0.0 }
 0x24b   : > { %2347 = vmatpush.bf16.msrb.mxu3 %v4503_v11  ;;  %1794 = vmatmul.bf16.gmra.mxu2 %v5189_v29  ;;  %v4499_v29 = vld [vmem:[%s5681_s6 + $0x100] sm:$0xff] }
 0x24c   : > { %v5381_v40 = vpack.c.b16 %v2467_v18, %v2466_v17  ;;  %v1848_v24 = vadd.f32 %v5220_v50, %v1812_v19  ;;  %v4539_v11 = vld [vmem:[%s5681_s6 + $0x240] sm:$0xff]  ;;  %2872 = vmatpush.bf16.msra.mxu2 %v4548_v5  ;;  %v1876_v19 = vmax.f32 %v1844_v7, 0.0  ;;  %3040 = vmatpush.bf16.msrb.mxu0 %v4570_v22  ;;  %v4574_v22 = vld [vmem:[%s5681_s6 + $0x358] sm:$0xff] }
 0x24d   : > { %2786 = vmatpush.bf16.msra.mxu1 %v4539_v11 }
 0x24e   : > { %v1755_v27 = vpop.f32.mrf.mxu2  ;;  %v1483_v25 = vpop.f32.mrf.mxu0  ;;  %v1880_v34 = vmax.f32 %v1848_v24, 0.0  ;;  %v4547_v24 = vld [vmem:[%s5681_s6 + $0x280] sm:$0xff] }
 0x24f   : > { %2348 = vmatpush.bf16.msrb.mxu3 %v4502_v63  ;;  %v1620_v41 = vpop.f32.mrf.mxu1 }
 0x250   : > { %v1621_v23 = vadd.f32 %v1620_v41, %v1483_v25  ;;  %v1912_v42 = vpack.c.bf16 %v1880_v34, %v1880_v34  ;;  %2873 = vmatpush.bf16.msra.mxu2 %v4547_v24  ;;  %v1908_v41 = vpack.c.bf16 %v1876_v19, %v1876_v19 }
 0x252   : > { %v1813_v30 = vadd.f32 %v1752_v4, %v1621_v23  ;;  %v2553_v59 = vunpack.c.l.b16 %v1912_v42 }
 0x253   : > { %2349 = vmatpush.bf16.msrb.mxu3 %v4501_v9 }
 0x254   : > { %v1849_v26 = vadd.f32 %v5220_v50, %v1813_v30 }
 0x256   : > { %v1881_v16 = vmax.f32 %v1849_v26, 0.0  ;;  %v1757_v44 = vpop.f32.mrf.mxu2  ;;  %v1486_v10 = vpop.f32.mrf.mxu0  ;;  %v2379_v26 = vunpack.c.l.b16 %v1908_v41  ;;  %v4515_v41 = vld [vmem:[%s5681_s6 + $0x180] sm:$0xff] }
 0x257   : > { %2350 = vmatpush.bf16.msrb.mxu3 %v4500_v47  ;;  %v1623_v49 = vpop.f32.mrf.mxu1 }
 0x258   : > { %v1913_v32 = vpack.c.bf16 %v1881_v16, %v1881_v16  ;;  %v1624_v48 = vadd.f32 %v1623_v49, %v1486_v10  ;;  %v4569_v16 = vld [vmem:[%s5681_s6 + $0x330] sm:$0xff] }
 0x259   : > { %3041 = vmatpush.bf16.msrb.mxu0 %v4569_v16  ;;  %v4528_v16 = vld [vmem:[%s5681_s6 + $0x1e8] sm:$0xff] }
 0x25a   : > { %v2554_v33 = vunpack.c.l.b16 %v1913_v32  ;;  %v1814_v43 = vadd.f32 %v1755_v27, %v1624_v48  ;;  %v1909_v27 = vpack.c.bf16 %v1877_v8, %v1877_v8  ;;  %v4568_v48 = vld [vmem:[%s5681_s6 + $0x328] sm:$0xff] }
 0x25b   : > { %2351 = vmatpush.bf16.msrb.mxu3 %v4499_v29  ;;  %v4507_v29 = vld [vmem:[%s5681_s6 + $0x140] sm:$0xff] }
 0x25c   : > { %v5411_v57 = vpack.c.b16 %v2554_v33, %v2553_v59  ;;  %v1850_v1 = vadd.f32 %v5220_v50, %v1814_v43  ;;  %v2380_v34 = vunpack.c.l.b16 %v1909_v27  ;;  %v4520_v43 = vld [vmem:[%s5681_s6 + $0x1a8] sm:$0xff]  ;;  %v4563_v27 = vld [vmem:[%s5681_s6 + $0x300] sm:$0xff] }
 0x25d   : > { %3042 = vmatpush.bf16.msrb.mxu0 %v4568_v48 }
 0x25e   : > { %2352 = vmatmul.bf16.vlgmr.msrb.gmra.mxu3 %v2294_v15  ;;  %v1760_v55 = vpop.f32.mrf.mxu2  ;;  %v1488_v31 = vpop.f32.mrf.mxu0  ;;  %v1882_v52 = vmax.f32 %v1850_v1, 0.0  ;;  %v4567_v1 = vld [vmem:[%s5681_s6 + $0x320] sm:$0xff] }
 0x25f   : > { %2431 = vmatpush.bf16.msra.mxu3 %v4514_v35  ;;  %v1625_v63 = vpop.f32.mrf.mxu1 }
 0x260   : > { %v1626_v53 = vadd.f32 %v1625_v63, %v1488_v31  ;;  %v1914_v46 = vpack.c.bf16 %v1882_v52, %v1882_v52  ;;  %v4566_v63 = vld [vmem:[%s5681_s6 + $0x318] sm:$0xff] }
 0x261   : > { %3043 = vmatpush.bf16.msrb.mxu0 %v4567_v1 }
 0x262   : > { %v1815_v4 = vadd.f32 %v1757_v44, %v1626_v53  ;;  %v2640_v3 = vunpack.c.l.b16 %v1914_v46  ;;  %v2381_v44 = vpack.c.b16 %v2380_v34, %v2379_v26  ;;  %v4578_v53 = vld [vmem:[%s5681_s6 + $0x378] sm:$0xff]  ;;  %v4565_v46 = vld [vmem:[%s5681_s6 + $0x310] sm:$0xff] }
 0x263   : > { %2432 = vmatpush.bf16.msra.mxu3 %v4513_v45  ;;  %v4521_v45 = vld [vmem:[%s5681_s6 + $0x1b0] sm:$0xff]  ;;  %3127 = vmatpush.bf16.msrb.mxu1 %v4578_v53  ;;  %v4586_v34 = vld [vmem:[%s5681_s6 + $0x3b8] sm:$0xff] }
 0x264   : > { %v1851_v6 = vadd.f32 %v5220_v50, %v1815_v4  ;;  %v4518_v4 = vld [vmem:[%s5681_s6 + $0x198] sm:$0xff]  ;;  %3214 = vmatpush.bf16.msrb.mxu2 %v4586_v34 }
 0x265   : > { %3044 = vmatpush.bf16.msrb.mxu0 %v4566_v63 }
 0x266   : > { %v1883_v54 = vmax.f32 %v1851_v6, 0.0  ;;  %v1762_v58 = vpop.f32.mrf.mxu2  ;;  %v1491_v9 = vpop.f32.mrf.mxu0 }
 0x267   : > { %2433 = vmatpush.bf16.msra.mxu3 %v4512_v51  ;;  %v1628_v13 = vpop.f32.mrf.mxu1 }
 0x268   : > { %v1915_v17 = vpack.c.bf16 %v1883_v54, %v1883_v54  ;;  %v1629_v18 = vadd.f32 %v1628_v13, %v1491_v9  ;;  %v4577_v54 = vld [vmem:[%s5681_s6 + $0x370] sm:$0xff]  ;;  %v4564_v13 = vld [vmem:[%s5681_s6 + $0x308] sm:$0xff] }
 0x269   : > { %3045 = vmatpush.bf16.msrb.mxu0 %v4565_v46  ;;  %3128 = vmatpush.bf16.msrb.mxu1 %v4577_v54  ;;  %v4580_v54 = vld [vmem:[%s5681_s6 + $0x388] sm:$0xff] }
 0x26a   : > { %v2641_v20 = vunpack.c.l.b16 %v1915_v17  ;;  %v1816_v47 = vadd.f32 %v1760_v55, %v1629_v18  ;;  %v4519_v55 = vld [vmem:[%s5681_s6 + $0x1a0] sm:$0xff]  ;;  %v4576_v17 = vld [vmem:[%s5681_s6 + $0x368] sm:$0xff] }
 0x26b   : > { %2434 = vmatpush.bf16.msra.mxu3 %v4511_v0 }
 0x26c   : > { %v2642_v25 = vpack.c.b16 %v2641_v20, %v2640_v3  ;;  %v1852_v37 = vadd.f32 %v5220_v50, %v1816_v47  ;;  %v4516_v3 = vld [vmem:[%s5681_s6 + $0x188] sm:$0xff] }
 0x26d   : > { %3046 = vmatpush.bf16.msrb.mxu0 %v4564_v13  ;;  %3129 = vmatpush.bf16.msrb.mxu1 %v4576_v17  ;;  %v4523_v13 = vld [vmem:[%s5681_s6 + $0x1c0] sm:$0xff] }
 0x26e   : > { %v1765_v23 = vpop.f32.mrf.mxu2  ;;  %2700 = vmatmul.bf16.vlgmr.msra.gmra.mxu0 %v2642_v25  ;;  %v1493_v30 = vpop.f32.mrf.mxu0  ;;  %v1884_v15 = vmax.f32 %v1852_v37, 0.0  ;;  %v4575_v25 = vld [vmem:[%s5681_s6 + $0x360] sm:$0xff] }
 0x26f   : > { %2435 = vmatpush.bf16.msra.mxu3 %v4510_v60  ;;  %v1630_v35 = vpop.f32.mrf.mxu1 }
 0x270   : > { %v1631_v39 = vadd.f32 %v1630_v35, %v1493_v30  ;;  %v1916_v10 = vpack.c.bf16 %v1884_v15, %v1884_v15  ;;  %v4573_v15 = vld [vmem:[%s5681_s6 + $0x350] sm:$0xff] }
 0x271   : > { %3047 = vmatpush.bf16.msrb.mxu0 %v4563_v27  ;;  %3130 = vmatpush.bf16.msrb.mxu1 %v4575_v25  ;;  %v4579_v27 = vld [vmem:[%s5681_s6 + $0x380] sm:$0xff] }
 0x272   : > { %v1817_v42 = vadd.f32 %v1762_v58, %v1631_v39  ;;  %v2727_v56 = vunpack.c.l.b16 %v1916_v10  ;;  %v4517_v58 = vld [vmem:[%s5681_s6 + $0x190] sm:$0xff] }
 0x273   : > { %2436 = vmatpush.bf16.msra.mxu3 %v4509_v38 }
 0x274   : > { %v1853_v12 = vadd.f32 %v5220_v50, %v1817_v42  ;;  %v4585_v42 = vld [vmem:[%s5681_s6 + $0x3b0] sm:$0xff] }
 0x275   : > { %3131 = vmatpush.bf16.msrb.mxu1 %v4574_v22  ;;  %3215 = vmatpush.bf16.msrb.mxu2 %v4585_v42 }
 0x276   : > { %v1885_v49 = vmax.f32 %v1853_v12, 0.0  ;;  %v1767_v32 = vpop.f32.mrf.mxu2  ;;  %v1496_v59 = vpop.f32.mrf.mxu0 }
 0x277   : > { %2437 = vmatpush.bf16.msra.mxu3 %v4508_v21  ;;  %v1633_v33 = vpop.f32.mrf.mxu1 }
 0x278   : > { %v1917_v51 = vpack.c.bf16 %v1885_v49, %v1885_v49  ;;  %v1634_v11 = vadd.f32 %v1633_v33, %v1496_v59 }
 0x279   : > { %3132 = vmatpush.bf16.msrb.mxu1 %v4573_v15 }
 0x27a   : > { %v2728_v61 = vunpack.c.l.b16 %v1917_v51  ;;  %v1818_v62 = vadd.f32 %v1765_v23, %v1634_v11  ;;  %v4530_v23 = vld [vmem:[%s5681_s6 + $0x1f8] sm:$0xff]  ;;  %v4583_v51 = vld [vmem:[%s5681_s6 + $0x3a0] sm:$0xff] }
 0x27b   : > { %2438 = vmatpush.bf16.msra.mxu3 %v4507_v29  ;;  %v4526_v11 = vld [vmem:[%s5681_s6 + $0x1d8] sm:$0xff] }
 0x27c   : > { %v2729_v0 = vpack.c.b16 %v2728_v61, %v2727_v56  ;;  %v1854_v28 = vadd.f32 %v5220_v50, %v1818_v62  ;;  %v4582_v62 = vld [vmem:[%s5681_s6 + $0x398] sm:$0xff] }
 0x27e   : > { %2439 = vmatmul.bf16.vlgmr.msra.gmra.mxu3 %v2381_v44  ;;  %v5472_v31 = vpop.f32.mrf.mxu2  ;;  %2787 = vmatmul.bf16.vlgmr.msra.gmra.mxu1 %v2729_v0  ;;  %v1498_v2 = vpop.f32.mrf.mxu0  ;;  %v1886_v6 = vmax.f32 %v1854_v28, 0.0  ;;  %v4525_v28 = vld [vmem:[%s5681_s6 + $0x1d0] sm:$0xff] }
 0x27f   : > { %2518 = vmatpush.bf16.msrb.mxu3 %v4522_v36  ;;  %v1635_v52 = vpop.f32.mrf.mxu1  ;;  %v4529_v36 = vld [vmem:[%s5681_s6 + $0x1f0] sm:$0xff] }
 0x280   : > { %v1636_v60 = vadd.f32 %v1635_v52, %v1498_v2  ;;  %v1918_v5 = vpack.c.bf16 %v1886_v6, %v1886_v6 }
 0x281   : > { %v2026_v14 = vpop.f32.mrf.mxu3 }
 0x282   : > { %v1819_v7 = vadd.f32 %v1767_v32, %v1636_v60  ;;  %v2814_v21 = vunpack.c.l.b16 %v1918_v5  ;;  %v4527_v32 = vld [vmem:[%s5681_s6 + $0x1e0] sm:$0xff] }
 0x283   : > { %2519 = vmatpush.bf16.msrb.mxu3 %v4521_v45  ;;  %v4584_v45 = vld [vmem:[%s5681_s6 + $0x3a8] sm:$0xff] }
 0x284   : > { %v1855_v38 = vadd.f32 %v5220_v50, %v1819_v7  ;;  %3216 = vmatpush.bf16.msrb.mxu2 %v4584_v45 }
 0x286   : > { %v1887_v8 = vmax.f32 %v1855_v38, 0.0  ;;  %v5493_v9 = vpop.f32.mrf.mxu2  ;;  %v5501_v18 = vpop.f32.mrf.mxu0 }
 0x287   : > { %2520 = vmatpush.bf16.msrb.mxu3 %v4520_v43  ;;  %v5503_v19 = vpop.f32.mrf.mxu1  ;;  %v4571_v43 = vld [vmem:[%s5681_s6 + $0x340] sm:$0xff] }
 0x288   : > { %v1919_v20 = vpack.c.bf16 %v1887_v8, %v1887_v8  ;;  %3217 = vmatpush.bf16.msrb.mxu2 %v4583_v51  ;;  %v1639_v42 = vadd.f32 %v5503_v19, %v5501_v18  ;;  %v4558_v18 = vld [vmem:[%s5681_s6 + $0x2d8] sm:$0xff] }
 0x289   : > { %v2028_v47 = vpop.f32.mrf.mxu3 }
 0x28a   : > { %v2815_v24 = vunpack.c.l.b16 %v1919_v20 }
 0x28b   : > { %2521 = vmatpush.bf16.msrb.mxu3 %v4519_v55 }
 0x28c   : > { %v2816_v37 = vpack.c.b16 %v2815_v24, %v2814_v21  ;;  %3218 = vmatpush.bf16.msrb.mxu2 %v4582_v62 }
 0x28e   : > { %v1775_v29 = vpop.f32.mrf.mxu2  ;;  %2874 = vmatmul.bf16.vlgmr.msra.gmra.mxu2 %v2816_v37  ;;  %v5526_v30 = vpop.f32.mrf.mxu0 }
 0x28f   : > { %2522 = vmatpush.bf16.msrb.mxu3 %v4518_v4  ;;  %v5528_v35 = vpop.f32.mrf.mxu1  ;;  %v4581_v4 = vld [vmem:[%s5681_s6 + $0x390] sm:$0xff] }
 0x290   : > { %3219 = vmatpush.bf16.msrb.mxu2 %v4581_v4 }
 0x291   : > { %v2094_v39 = vpop.f32.mrf.mxu3 }
 0x292   : > { %v2095_v26 = vadd.f32 %v2094_v39, %v2026_v14  ;;  %v4524_v14 = vld [vmem:[%s5681_s6 + $0x1c8] sm:$0xff]  ;;  %v1641_v39 = vadd.f32 %v5528_v35, %v5526_v30  ;;  %v1820_v30 = vadd.f32 %v5472_v31, %v1639_v42  ;;  %v4557_v31 = vld [vmem:[%s5681_s6 + $0x2d0] sm:$0xff] }
 0x293   : > { %2523 = vmatpush.bf16.msrb.mxu3 %v4517_v58 }
 0x294   : > { %3220 = vmatpush.bf16.msrb.mxu2 %v4580_v54 }
 0x296   : > { %v1777_v44 = vpop.f32.mrf.mxu2  ;;  %v1506_v12 = vpop.f32.mrf.mxu0 }
 0x297   : > { %2524 = vmatpush.bf16.msrb.mxu3 %v4516_v3  ;;  %v1643_v10 = vpop.f32.mrf.mxu1  ;;  %v4562_v3 = vld [vmem:[%s5681_s6 + $0x2f8] sm:$0xff] }
 0x298   : > { %v1644_v49 = vadd.f32 %v1643_v10, %v1506_v12  ;;  %3221 = vmatpush.bf16.msrb.mxu2 %v4579_v27 }
 0x299   : > { %v2096_v48 = vpop.f32.mrf.mxu3 }
 0x29a   : > { %v1822_v59 = vadd.f32 %v1775_v29, %v1644_v49  ;;  %v2097_v33 = vadd.f32 %v2096_v48, %v2028_v47 }
 0x29b   : > { %2525 = vmatpush.bf16.msrb.mxu3 %v4515_v41  ;;  %v4561_v41 = vld [vmem:[%s5681_s6 + $0x2f0] sm:$0xff] }
 0x29c   : > { %v1858_v56 = vadd.f32 %v5220_v50, %v1822_v59 }
 0x29e   : > { %2526 = vmatmul.bf16.vlgmr.msrb.gmra.mxu3 %v5381_v40  ;;  %v4572_v40 = vld [vmem:[%s5681_s6 + $0x348] sm:$0xff]  ;;  %v1780_v61 = vpop.f32.mrf.mxu2  ;;  %v1508_v1 = vpop.f32.mrf.mxu0  ;;  %v1890_v53 = vmax.f32 %v1858_v56, 0.0 }
 0x29f   : > { %2605 = vmatpush.bf16.msra.mxu3 %v4530_v23  ;;  %3133 = vmatpush.bf16.msrb.mxu1 %v4572_v40  ;;  %v1645_v55 = vpop.f32.mrf.mxu1 }
 0x2a0   : > { %v1646_v0 = vadd.f32 %v1645_v55, %v1508_v1  ;;  %v1922_v6 = vpack.c.bf16 %v1890_v53, %v1890_v53 }
 0x2a1   : > { %v2179_v63 = vpop.f32.mrf.mxu3 }
 0x2a2   : > { %v1823_v2 = vadd.f32 %v1777_v44, %v1646_v0  ;;  %v5568_v52 = vadd.f32 %v2179_v63, %v2095_v26  ;;  %v2988_v20 = vunpack.c.l.b16 %v1922_v6  ;;  %v1821_v44 = vadd.f32 %v5493_v9, %v1641_v39  ;;  %v4556_v63 = vld [vmem:[%s5681_s6 + $0x2c8] sm:$0xff] }
 0x2a3   : > { %2606 = vmatpush.bf16.msra.mxu3 %v4529_v36  ;;  %3134 = vmatpush.bf16.msrb.mxu1 %v4571_v43  ;;  %v4560_v36 = vld [vmem:[%s5681_s6 + $0x2e8] sm:$0xff]  ;;  %v1856_v9 = vadd.f32 %v5220_v50, %v1820_v30 }
 0x2a4   : > { %v1859_v60 = vadd.f32 %v5220_v50, %v1823_v2  ;;  %v1857_v19 = vadd.f32 %v5220_v50, %v1821_v44 }
 0x2a5   : > { %v1888_v0 = vmax.f32 %v1856_v9, 0.0 }
 0x2a6   : > { %v1891_v7 = vmax.f32 %v1859_v60, 0.0  ;;  %v1782_v46 = vpop.f32.mrf.mxu2  ;;  %v1511_v58 = vpop.f32.mrf.mxu0  ;;  %v1889_v51 = vmax.f32 %v1857_v19, 0.0 }
 0x2a7   : > { %2607 = vmatpush.bf16.msra.mxu3 %v4528_v16  ;;  %v1648_v38 = vpop.f32.mrf.mxu1  ;;  %v1920_v60 = vpack.c.bf16 %v1888_v0, %v1888_v0 }
 0x2a8   : > { %v1923_v5 = vpack.c.bf16 %v1891_v7, %v1891_v7  ;;  %v1649_v8 = vadd.f32 %v1648_v38, %v1511_v58  ;;  %v1921_v53 = vpack.c.bf16 %v1889_v51, %v1889_v51  ;;  %v4594_v38 = vld [vmem:[%s5681_s6 + $0x3f8] sm:$0xff] }
 0x2a9   : > { %v2181_v17 = vpop.f32.mrf.mxu3 }
 0x2aa   : > { %v2989_v47 = vunpack.c.l.b16 %v1923_v5  ;;  %v1824_v21 = vadd.f32 %v1780_v61, %v1649_v8  ;;  %v5586_v24 = vadd.f32 %v2181_v17, %v2097_v33  ;;  %v2902_v6 = vunpack.c.l.b16 %v1921_v53 }
 0x2ab   : > { %2608 = vmatpush.bf16.msra.mxu3 %v4527_v32  ;;  %v2901_v17 = vunpack.c.l.b16 %v1920_v60 }
 0x2ac   : > { %v2990_v25 = vpack.c.b16 %v2989_v47, %v2988_v20  ;;  %v1860_v37 = vadd.f32 %v5220_v50, %v1824_v21  ;;  %v4593_v21 = vld [vmem:[%s5681_s6 + $0x3f0] sm:$0xff] }
 0x2ae   : > { %v1785_v23 = vpop.f32.mrf.mxu2  ;;  %3048 = vmatmul.bf16.vlgmr.msrb.gmra.mxu0 %v2990_v25  ;;  %v1513_v29 = vpop.f32.mrf.mxu0  ;;  %v1892_v26 = vmax.f32 %v1860_v37, 0.0 }
 0x2af   : > { %2609 = vmatpush.bf16.msra.mxu3 %v4526_v11  ;;  %v1650_v22 = vpop.f32.mrf.mxu1 }
 0x2b0   : > { %v1651_v34 = vadd.f32 %v1650_v22, %v1513_v29  ;;  %v1924_v40 = vpack.c.bf16 %v1892_v26, %v1892_v26  ;;  %v4591_v22 = vld [vmem:[%s5681_s6 + $0x3e0] sm:$0xff]  ;;  %v4590_v26 = vld [vmem:[%s5681_s6 + $0x3d8] sm:$0xff] }
 0x2b2   : > { %v1825_v15 = vadd.f32 %v1782_v46, %v1651_v34  ;;  %v3075_v48 = vunpack.c.l.b16 %v1924_v40 }
 0x2b3   : > { %2610 = vmatpush.bf16.msra.mxu3 %v4525_v28 }
 0x2b4   : > { %v1861_v16 = vadd.f32 %v5220_v50, %v1825_v15  ;;  %v4623_v15 = vld [vmem:[%s5680_s5] ss:$0 sm:$0xff] }
 0x2b6   : > { %v1893_v45 = vmax.f32 %v1861_v16, 0.0  ;;  %v1787_v12 = vpop.f32.mrf.mxu2  ;;  %v1516_v10 = vpop.f32.mrf.mxu0 }
 0x2b7   : > { %2611 = vmatpush.bf16.msra.mxu3 %v4524_v14  ;;  %v1653_v49 = vpop.f32.mrf.mxu1 }
 0x2b8   : > { %v1925_v35 = vpack.c.bf16 %v1893_v45, %v1893_v45  ;;  %v1654_v32 = vadd.f32 %v1653_v49, %v1516_v10  ;;  %v4588_v45 = vld [vmem:[%s5681_s6 + $0x3c8] sm:$0xff]  ;;  %v4587_v49 = vld [vmem:[%s5681_s6 + $0x3c0] sm:$0xff] }
 0x2ba   : > { %v3076_v59 = vunpack.c.l.b16 %v1925_v35  ;;  %v1826_v33 = vadd.f32 %v1785_v23, %v1654_v32 }
 0x2bb   : > { %2612 = vmatpush.bf16.msra.mxu3 %v4523_v13 }
 0x2bc   : > { %v3077_v43 = vpack.c.b16 %v3076_v59, %v3075_v48  ;;  %v1862_v11 = vadd.f32 %v5220_v50, %v1826_v33 }
 0x2be   : > { %2613 = vmatmul.bf16.vlgmr.msra.gmra.mxu3 %v5411_v57  ;;  %v4559_v57 = vld [vmem:[%s5681_s6 + $0x2e0] sm:$0xff]  ;;  %v1790_v56 = vpop.f32.mrf.mxu2  ;;  %3135 = vmatmul.bf16.vlgmr.msrb.gmra.mxu1 %v3077_v43  ;;  %v1518_v1 = vpop.f32.mrf.mxu0  ;;  %v1894_v2 = vmax.f32 %v1862_v11, 0.0 }
 0x2bf   : > { %2953 = vmatpush.bf16.msrb.mxu3 %v4562_v3  ;;  %v1655_v55 = vpop.f32.mrf.mxu1  ;;  %v2903_v3 = vpack.c.b16 %v2902_v6, %v2901_v17 }
 0x2c0   : > { %v1656_v28 = vadd.f32 %v1655_v55, %v1518_v1  ;;  %v1926_v7 = vpack.c.bf16 %v1894_v2, %v1894_v2 }
 0x2c1   : > { %v2266_v61 = vpop.f32.mrf.mxu3 }
 0x2c2   : > { %v5619_v62 = vadd.f32 %v2266_v61, %v5568_v52  ;;  %v1827_v4 = vadd.f32 %v1787_v12, %v1656_v28  ;;  %v4555_v52 = vld [vmem:[%s5681_s6 + $0x2c0] sm:$0xff]  ;;  %v3162_v20 = vunpack.c.l.b16 %v1926_v7 }
 0x2c3   : > { %2954 = vmatpush.bf16.msrb.mxu3 %v4561_v41 }
 0x2c4   : > { %v1863_v14 = vadd.f32 %v5220_v50, %v1827_v4 }
 0x2c6   : > { %v1895_v46 = vmax.f32 %v1863_v14, 0.0  ;;  %v1792_v54 = vpop.f32.mrf.mxu2  ;;  %v1521_v8 = vpop.f32.mrf.mxu0 }
 0x2c7   : > { %2955 = vmatpush.bf16.msrb.mxu3 %v4560_v36  ;;  %v1658_v13 = vpop.f32.mrf.mxu1 }
 0x2c8   : > { %v1927_v50 = vpack.c.bf16 %v1895_v46, %v1895_v46  ;;  %v1659_v29 = vadd.f32 %v1658_v13, %v1521_v8 }
 0x2c9   : > { %v2268_v58 = vpop.f32.mrf.mxu3 }
 0x2ca   : > { %v2272_v5 = vadd.f32 %v2268_v58, %v5586_v24  ;;  %v3163_v47 = vunpack.c.l.b16 %v1927_v50  ;;  %v4592_v24 = vld [vmem:[%s5681_s6 + $0x3e8] sm:$0xff]  ;;  %v1828_v36 = vadd.f32 %v1790_v56, %v1659_v29 }
 0x2cb   : > { %2956 = vmatpush.bf16.msrb.mxu3 %v4559_v57  ;;  %v4589_v57 = vld [vmem:[%s5681_s6 + $0x3d0] sm:$0xff] }
 0x2cc   : > { %v3164_v27 = vpack.c.b16 %v3163_v47, %v3162_v20  ;;  %v1864_v16 = vadd.f32 %v4623_v15, %v1828_v36 }
 0x2ce   : > { %v1795_v25 = vpop.f32.mrf.mxu2  ;;  %3222 = vmatmul.bf16.vlgmr.msrb.gmra.mxu2 %v3164_v27  ;;  %v1523_v41 = vpop.f32.mrf.mxu0  ;;  %v1896_v40 = vmax.f32 %v1864_v16, 0.0 }
 0x2cf   : > { %2957 = vmatpush.bf16.msrb.mxu3 %v4558_v18  ;;  %v1660_v37 = vpop.f32.mrf.mxu1  ;;  %v4621_v25 = vld [vmem:[%s5682_s7] ss:$0 sm:$0xff] }
 0x2d0   : > { %v1661_v23 = vadd.f32 %v1660_v37, %v1523_v41  ;;  %v1928_v10 = vpack.c.bf16 %v1896_v40, %v1896_v40 }
 0x2d2   : > { %v1829_v34 = vadd.f32 %v1792_v54, %v1661_v23  ;;  %v3249_v35 = vunpack.c.l.b16 %v1928_v10 }
 0x2d3   : > { %2958 = vmatpush.bf16.msrb.mxu3 %v4557_v31 }
 0x2d4   : > { %v1865_v42 = vadd.f32 %v4623_v15, %v1829_v34 }
 0x2d6   : > { %v1796_v39 = vpop.f32.mrf.mxu2  ;;  %v1897_v44 = vmax.f32 %v1865_v42, 0.0 }
 0x2d7   : > { %2959 = vmatpush.bf16.msrb.mxu3 %v4556_v63 }
 0x2d8   : > { %v1929_v12 = vpack.c.bf16 %v1897_v44, %v1897_v44 }
 0x2da   : > { %v3250_v30 = vunpack.c.l.b16 %v1929_v12 }
 0x2db   : > { %2960 = vmatpush.bf16.msrb.mxu3 %v4555_v52 }
 0x2dc   : > { %v3251_v32 = vpack.c.b16 %v3250_v30, %v3249_v35 }
 0x2de   : > { %2961 = vmatmul.bf16.vlgmr.msrb.gmra.mxu3 %v2903_v3 }
 0x2df   : > { %3301 = vmatpush.bf16.msra.mxu3 %v4594_v38 }
 0x2e1   : > { %v2353_v18 = vpop.f32.mrf.mxu3 }
 0x2e2   : > { %v2358_v31 = vadd.f32 %v2353_v18, %v5619_v62 }
 0x2e3   : > { %3302 = vmatpush.bf16.msra.mxu3 %v4593_v21 }
 0x2e7   : > { %3303 = vmatpush.bf16.msra.mxu3 %v4592_v24 }
 0x2e9   : > { %v2355_v19 = vpop.f32.mrf.mxu3 }
 0x2ea   : > { %v2359_v0 = vadd.f32 %v2355_v19, %v2272_v5 }
 0x2eb   : > { %3304 = vmatpush.bf16.msra.mxu3 %v4591_v22  ;;  %v2701_v11 = vpop.f32.mrf.mxu0 }
 0x2ef   : > { %3305 = vmatpush.bf16.msra.mxu3 %v4590_v26 }
 0x2f3   : > { %3306 = vmatpush.bf16.msra.mxu3 %v4589_v57  ;;  %v2703_v4 = vpop.f32.mrf.mxu0 }
 0x2f7   : > { %3307 = vmatpush.bf16.msra.mxu3 %v4588_v45 }
 0x2fb   : > { %3308 = vmatpush.bf16.msra.mxu3 %v4587_v49  ;;  %v2788_v1 = vpop.f32.mrf.mxu1 }
 0x2fe   : > { %3309 = vmatmul.bf16.vlgmr.msra.gmra.mxu3 %v3251_v32 }
 0x301   : > { %v2440_v48 = vpop.f32.mrf.mxu3 }
 0x302   : > { %v2445_v51 = vadd.f32 %v2440_v48, %v2358_v31 }
 0x303   : > { %v2790_v6 = vpop.f32.mrf.mxu1 }
 0x309   : > { %v2442_v59 = vpop.f32.mrf.mxu3 }
 0x30a   : > { %v2446_v28 = vadd.f32 %v2442_v59, %v2359_v0 }
 0x311   : > { %v2875_v53 = vpop.f32.mrf.mxu2 }
 0x319   : > { %v2877_v54 = vpop.f32.mrf.mxu2 }
 0x321   : > { %v2527_v33 = vpop.f32.mrf.mxu3 }
 0x322   : > { %v2532_v56 = vadd.f32 %v2527_v33, %v2445_v51 }
 0x329   : > { %v2529_v9 = vpop.f32.mrf.mxu3 }
 0x32a   : > { %v2533_v2 = vadd.f32 %v2529_v9, %v2446_v28 }
 0x32b   : > { %v3049_v58 = vpop.f32.mrf.mxu0 }
 0x333   : > { %v3051_v47 = vpop.f32.mrf.mxu0 }
 0x33b   : > { %v3136_v5 = vpop.f32.mrf.mxu1 }
 0x341   : > { %v2614_v43 = vpop.f32.mrf.mxu3 }
 0x342   : > { %v2619_v61 = vadd.f32 %v2614_v43, %v2532_v56 }
 0x343   : > { %v3138_v37 = vpop.f32.mrf.mxu1 }
 0x344   : > { %v2706_v63 = vadd.f32 %v2701_v11, %v2619_v61 }
 0x346   : > { %v2793_v14 = vadd.f32 %v2788_v1, %v2706_v63 }
 0x348   : > { %v2880_v46 = vadd.f32 %v2875_v53, %v2793_v14 }
 0x349   : > { %v2616_v55 = vpop.f32.mrf.mxu3 }
 0x34a   : > { %v2620_v60 = vadd.f32 %v2616_v55, %v2533_v2 }
 0x34c   : > { %v2707_v7 = vadd.f32 %v2703_v4, %v2620_v60 }
 0x34e   : > { %v2794_v38 = vadd.f32 %v2790_v6, %v2707_v7 }
 0x350   : > { %v2881_v17 = vadd.f32 %v2877_v54, %v2794_v38 }
 0x351   : > { %v3223_v20 = vpop.f32.mrf.mxu2 }
 0x359   : > { %v3225_v22 = vpop.f32.mrf.mxu2 }
 0x361   : > { %v2962_v52 = vpop.f32.mrf.mxu3 }
 0x362   : > { %v2967_v62 = vadd.f32 %v2962_v52, %v2880_v46 }
 0x364   : > { %v3054_v8 = vadd.f32 %v3049_v58, %v2967_v62 }
 0x366   : > { %v3141_v50 = vadd.f32 %v3136_v5, %v3054_v8 }
 0x368   : > { %v3228_v21 = vadd.f32 %v3223_v20, %v3141_v50 }
 0x369   : > { %v2964_v13 = vpop.f32.mrf.mxu3 }
 0x36a   : > { %v2968_v3 = vadd.f32 %v2964_v13, %v2881_v17 }
 0x36c   : > { %v3055_v27 = vadd.f32 %v3051_v47, %v2968_v3 }
 0x36e   : > { %v3142_v23 = vadd.f32 %v3138_v37, %v3055_v27 }
 0x370   : > { %v3229_v34 = vadd.f32 %v3225_v22, %v3142_v23 }
 0x381   : > { %v3310_v24 = vpop.f32.mrf.mxu3 }
 0x382   : > { %v3315_v41 = vadd.f32 %v3310_v24, %v3228_v21 }
 0x384   : > { %v3321_v29 = vadd.f32 %v4621_v25, %v3315_v41 }
 0x386   : > { %3323 = vst [vmem:[%s467_s18] sm:$0xff] %v3321_v29 }
 0x389   : > { %v3312_v36 = vpop.f32.mrf.mxu3 }
 0x38a   : > { %v3316_v39 = vadd.f32 %v3312_v36, %v3229_v34 }
 0x38c   : > { %v3322_v26 = vadd.f32 %v4621_v25, %v3316_v39 }
 0x38e   : > { %3324 = vst [vmem:[%s467_s18 + $0x8] sm:$0xff] %v3322_v26 }
 0x38f PF: > { %p15_p9 = scmp.ge.s32.totalorder %s4710_s9, 4   ;;  %s5684_s27 = smov %s4642_s28 }
 0x390   : > { %s5685_s28 = smov %s4719_s12  ;;  %s5686_s29 = smov %s4710_s9 }
 0x391   :  { %17 = sbr.rel (!%p15_p9) target bundleno = 2 (0x2), region = 142 }

</bundles_post_ra>
